<compile_context>
chip_gen: v7x
topology: tpu7x:2x2x1
jax: 0.10.0
libtpu: 0.0.40
codegen_flags: <defaults>
</compile_context>

<pallas_src>
import math

import jax
import jax.numpy as jnp
from jax.experimental import pallas as pl
from jax.experimental.pallas import tpu as pltpu

# ----------------------------- config (small) -------------------------------
VOCAB    = 32
PAD_IDX  = 0
B        = 2
S        = 8
H        = 32          # hidden_dim
N_HEADS  = 4
HEAD_DIM = H // N_HEADS
FF       = 64          # position-wise FFN inner dim
N_LAYERS = 2
EPS      = 1e-5
NEG_INF  = -1e10
OUT_PAD  = 128         # lane-padded classifier output width

VMEM_SPEC = pl.BlockSpec(memory_space=pltpu.MemorySpace.VMEM)


def _layer_norm(x, g, b):
    mean = jnp.mean(x, axis=-1, keepdims=True)
    var = jnp.mean((x - mean) ** 2, axis=-1, keepdims=True)
    return (x - mean) * jax.lax.rsqrt(var + EPS) * g + b


# --------------------------- fused forward kernel ----------------------------
def fused_forward_kernel(ids_ref, bias_ref, tok_ref, pos_ref,
                         wqkv_ref, bqkv_ref, wo_ref,
                         w1_ref, b1_ref, w2_ref, hv_ref, wc_ref, bc_ref,
                         out_ref):
    """Whole forward (embedding + N_LAYERS encoder layers + CLS head).

    ids_ref  : (B*S, 1) int32  token ids
    bias_ref : (B, 1, S)       additive key-padding bias (0 valid / -1e10 pad)
    tok_ref  : (VOCAB, H)      token embedding, pre-scaled by sqrt(H)
    pos_ref  : (S, H)          positional embedding
    wqkv_ref : (L, H, 3H)      Wq|Wk|Wv; Q columns pre-scaled by 1/sqrt(HEAD_DIM)
    bqkv_ref : (L, 1, 3H)
    wo_ref   : (L, H, H)
    w1_ref   : (L, H, FF)      b1_ref : (L, 1, FF)
    w2_ref   : (L, FF, H)
    hv_ref   : (L, 6, H)       rows: bo, ln1_g, ln1_b, b2, ln2_g, ln2_b
    wc_ref   : (H, OUT_PAD)    bc_ref : (1, OUT_PAD)   (lane-padded classifier)
    out_ref  : (B, OUT_PAD)
    """
    ids = ids_ref[...]                                       # (B*S, 1) int32
    bias = bias_ref[...]                                     # (B, 1, S)

    # --- token embedding as a one-hot MXU matmul (fused gather) ---
    iota = jax.lax.broadcasted_iota(jnp.int32, (B * S, VOCAB), 1)
    onehot = jnp.where(ids == iota, 1.0, 0.0)                # (B*S, VOCAB)
    x = jnp.dot(onehot, tok_ref[...],
                preferred_element_type=jnp.float32)          # (B*S, H), *sqrt(H) folded
    x = (x.reshape(B, S, H) + pos_ref[...][None]).reshape(B * S, H)
    # TODO(synk): encoder-input dropout omitted (eval/inference mode).

    for layer in range(N_LAYERS):                            # statically unrolled
        hv = hv_ref[layer]                                   # (6, H)

        # fused QKV projection: one (B*S, H) @ (H, 3H) MXU matmul
        qkv = (jnp.dot(x, wqkv_ref[layer], preferred_element_type=jnp.float32)
               + bqkv_ref[layer])                            # (B*S, 3H)

        # Heads statically unrolled; Wo fused into the loop via sublane row
        # slices (no lane-axis concat of per-head contexts).
        wo_l = wo_ref[layer]                                 # (H, H)
        attn_out = hv[0:1]                                   # bo, broadcasts on first add
        for hd in range(N_HEADS):
            q0 = hd * HEAD_DIM
            k0 = H + hd * HEAD_DIM
            v0 = 2 * H + hd * HEAD_DIM
            qh = qkv[:, q0:q0 + HEAD_DIM].reshape(B, S, HEAD_DIM)
            kh = qkv[:, k0:k0 + HEAD_DIM].reshape(B, S, HEAD_DIM)
            vh = qkv[:, v0:v0 + HEAD_DIM].reshape(B, S, HEAD_DIM)

            # 1/sqrt(HEAD_DIM) already folded into the Q weight columns.
            s = jnp.einsum('bqd,bkd->bqk', qh, kh,
                           preferred_element_type=jnp.float32)
            # Softmax without max-subtraction: logits are bounded small and
            # the -1e10 pad bias underflows exp() to exactly 0; position 0
            # ([CLS]) is never PAD so the denominator is nonzero.
            p = jnp.exp(s + bias)
            p = p * pl.reciprocal(jnp.sum(p, axis=-1, keepdims=True),
                                  approx=True)
            ctx_h = jnp.einsum('bqk,bkd->bqd', p, vh,
                               preferred_element_type=jnp.float32)
            attn_out = attn_out + jnp.dot(
                ctx_h.reshape(B * S, HEAD_DIM),
                wo_l[q0:q0 + HEAD_DIM, :],                   # sublane row slice
                preferred_element_type=jnp.float32)

        y = _layer_norm(x + attn_out, hv[1:2], hv[2:3])      # post-LN residual 1

        # TODO(synk): dropout inside the encoder layer omitted (eval mode).
        h1 = jnp.maximum(
            jnp.dot(y, w1_ref[layer], preferred_element_type=jnp.float32)
            + b1_ref[layer], 0.0)
        h2 = (jnp.dot(h1, w2_ref[layer], preferred_element_type=jnp.float32)
              + hv[3:4])
        x = _layer_norm(y + h2, hv[4:5], hv[5:6])            # post-LN residual 2

    # classifier on the [CLS] token (position 0 of every sequence); the
    # weights are lane-padded to OUT_PAD so this is an unmasked full-lane store.
    cls = x.reshape(B, S, H)[:, 0, :]                        # (B, H)
    out_ref[...] = (jnp.dot(cls, wc_ref[...],
                            preferred_element_type=jnp.float32)
                    + bc_ref[...]).astype(out_ref.dtype)


def fused_forward(ids_flat, attn_bias, p):
    args = (ids_flat, attn_bias, p['tok_emb'], p['pos_emb'],
            p['wqkv'], p['bqkv'], p['wo'],
            p['w1'], p['b1'], p['w2'], p['hvecs'], p['wc_pad'], p['bc_pad'])
    return pl.pallas_call(
        fused_forward_kernel,
        out_shape=jax.ShapeDtypeStruct((B, OUT_PAD), jnp.float32),
        in_specs=[VMEM_SPEC] * len(args),
        out_specs=VMEM_SPEC,
    )(*args)


# ------------------------------ parameters ----------------------------------
def init_params(key):
    ks = jax.random.split(key, 7)

    def nrm(k, shape):
        return jax.random.normal(k, shape, jnp.float32) * 0.02

    # stacked per-layer "vector" params: rows = bo, ln1_g, ln1_b, b2, ln2_g, ln2_b
    hv_template = jnp.stack([
        jnp.zeros((H,), jnp.float32),   # bo
        jnp.ones((H,), jnp.float32),    # ln1 gamma
        jnp.zeros((H,), jnp.float32),   # ln1 beta
        jnp.zeros((H,), jnp.float32),   # b2
        jnp.ones((H,), jnp.float32),    # ln2 gamma
        jnp.zeros((H,), jnp.float32),   # ln2 beta
    ])                                   # (6, H)

    # Fold the forward-pass * sqrt(H) into the token-embedding table.
    tok_emb = nrm(ks[0], (VOCAB, H)) * math.sqrt(H)

    # Fold the attention 1/sqrt(HEAD_DIM) scale into the Q columns of Wqkv.
    wqkv = nrm(ks[2], (N_LAYERS, H, 3 * H))
    wqkv = wqkv.at[:, :, :H].multiply(1.0 / math.sqrt(HEAD_DIM))

    # Lane-pad the classifier to OUT_PAD columns (real logit lives in column 0).
    wc = nrm(ks[6], (H, 1))
    wc_pad = jnp.zeros((H, OUT_PAD), jnp.float32).at[:, 0:1].set(wc)
    bc_pad = jnp.zeros((1, OUT_PAD), jnp.float32)

    return {
        'tok_emb': tok_emb,                                  # pre-scaled by sqrt(H)
        'pos_emb': nrm(ks[1], (S, H)),
        'wqkv':  wqkv,                                       # Wq|Wk|Wv, Q pre-scaled
        'bqkv':  jnp.zeros((N_LAYERS, 1, 3 * H), jnp.float32),
        'wo':    nrm(ks[3], (N_LAYERS, H, H)),
        'w1':    nrm(ks[4], (N_LAYERS, H, FF)),
        'b1':    jnp.zeros((N_LAYERS, 1, FF), jnp.float32),
        'w2':    nrm(ks[5], (N_LAYERS, FF, H)),
        'hvecs': jnp.tile(hv_template[None], (N_LAYERS, 1, 1)),
        'wc_pad': wc_pad,
        'bc_pad': bc_pad,
    }


# ------------------------------ forward pass ---------------------------------
@jax.jit
def forward(x_ids, params):
    # additive key-padding attention bias (tiny; fused into the jitted prologue)
    attn_bias = jnp.where(x_ids == PAD_IDX, NEG_INF, 0.0).astype(jnp.float32)
    attn_bias = attn_bias[:, None, :]                        # (B, 1, S)

    ids_flat = x_ids.reshape(B * S, 1).astype(jnp.int32)     # gather done in-kernel

    out = fused_forward(ids_flat, attn_bias, params)         # (B, OUT_PAD)
    return out[:, :1]                                        # (B, 1)


# ---------------------------------- main -------------------------------------
if __name__ == "__main__":
    key = jax.random.PRNGKey(0)
    pkey, xkey = jax.random.split(key)
    params = init_params(pkey)

    # token ids in [1, VOCAB); pad the tail of the second sequence with PAD_IDX
    x_ids = jax.random.randint(xkey, (B, S), 1, VOCAB, dtype=jnp.int32)
    x_ids = x_ids.at[1, -3:].set(PAD_IDX)

    logits = forward(x_ids, params)
    jax.block_until_ready(logits)
    assert logits.shape == (B, 1) and logits.dtype == jnp.float32
    assert bool(jnp.all(jnp.isfinite(logits)))
    print("KERNEL_OK")
</pallas_src>

<mosaic_0001>
module attributes {stable_mosaic.version = 11 : i64} {
  func.func @fused_forward_kernel(%arg0: memref<16x1xi32, #tpu.memory_space<vmem>>, %arg1: memref<2x1x8xf32, #tpu.memory_space<vmem>>, %arg2: memref<32x32xf32, #tpu.memory_space<vmem>>, %arg3: memref<8x32xf32, #tpu.memory_space<vmem>>, %arg4: memref<2x32x96xf32, #tpu.memory_space<vmem>>, %arg5: memref<2x1x96xf32, #tpu.memory_space<vmem>>, %arg6: memref<2x32x32xf32, #tpu.memory_space<vmem>>, %arg7: memref<2x32x64xf32, #tpu.memory_space<vmem>>, %arg8: memref<2x1x64xf32, #tpu.memory_space<vmem>>, %arg9: memref<2x64x32xf32, #tpu.memory_space<vmem>>, %arg10: memref<2x6x32xf32, #tpu.memory_space<vmem>>, %arg11: memref<32x128xf32, #tpu.memory_space<vmem>>, %arg12: memref<1x128xf32, #tpu.memory_space<vmem>>, %arg13: memref<2x128xf32, #tpu.memory_space<vmem>>) attributes {dimension_semantics = [], scalar_prefetch = 0 : i64, scratch_operands = 0 : i64, tpu.core_type = #tpu.core_type<tc>} {
    %c0 = arith.constant 0 : index
    %c0_0 = arith.constant 0 : index
    %0 = vector.load %arg0[%c0, %c0_0] : memref<16x1xi32, #tpu.memory_space<vmem>>, vector<16x1xi32>
    %c0_1 = arith.constant 0 : index
    %c0_2 = arith.constant 0 : index
    %c0_3 = arith.constant 0 : index
    %1 = vector.load %arg1[%c0_1, %c0_2, %c0_3] : memref<2x1x8xf32, #tpu.memory_space<vmem>>, vector<2x1x8xf32>
    %2 = tpu.iota {dimensions = array<i32: 1>} : vector<16x32xi32>
    %3 = vector.broadcast %0 : vector<16x1xi32> to vector<16x32xi32>
    %4 = arith.cmpi eq, %3, %2 : vector<16x32xi32>
    %cst = arith.constant 1.000000e+00 : f32
    %cst_4 = arith.constant 0.000000e+00 : f32
    %5 = vector.broadcast %cst : f32 to vector<16x32xf32>
    %6 = vector.broadcast %cst_4 : f32 to vector<16x32xf32>
    %7 = arith.select %4, %5, %6 : vector<16x32xi1>, vector<16x32xf32>
    %c0_5 = arith.constant 0 : index
    %c0_6 = arith.constant 0 : index
    %8 = vector.load %arg2[%c0_5, %c0_6] : memref<32x32xf32, #tpu.memory_space<vmem>>, vector<32x32xf32>
    %cst_7 = arith.constant dense<0.000000e+00> : vector<16x32xf32>
    %9 = tpu.matmul %7, %8, %cst_7 {dimension_numbers = #tpu.dot_dimension_numbers<[1], [0], [0], [1], [0, 0, 1, 1], [], []>} : vector<16x32xf32>, vector<32x32xf32>, vector<16x32xf32> -> vector<16x32xf32>
    %10 = vector.shape_cast %9 : vector<16x32xf32> to vector<2x8x32xf32>
    %c0_8 = arith.constant 0 : index
    %c0_9 = arith.constant 0 : index
    %11 = vector.load %arg3[%c0_8, %c0_9] : memref<8x32xf32, #tpu.memory_space<vmem>>, vector<8x32xf32>
    %12 = vector.shape_cast %11 : vector<8x32xf32> to vector<1x8x32xf32>
    %13 = vector.broadcast %12 : vector<1x8x32xf32> to vector<2x8x32xf32>
    %14 = arith.addf %10, %13 : vector<2x8x32xf32>
    %15 = vector.shape_cast %14 : vector<2x8x32xf32> to vector<16x32xf32>
    %c0_10 = arith.constant 0 : index
    %c0_11 = arith.constant 0 : index
    %c0_12 = arith.constant 0 : index
    %16 = vector.load %arg10[%c0_10, %c0_11, %c0_12] : memref<2x6x32xf32, #tpu.memory_space<vmem>>, vector<1x6x32xf32>
    %17 = vector.shape_cast %16 : vector<1x6x32xf32> to vector<6x32xf32>
    %c0_13 = arith.constant 0 : index
    %c0_14 = arith.constant 0 : index
    %c0_15 = arith.constant 0 : index
    %18 = vector.load %arg4[%c0_13, %c0_14, %c0_15] : memref<2x32x96xf32, #tpu.memory_space<vmem>>, vector<1x32x96xf32>
    %19 = vector.shape_cast %18 : vector<1x32x96xf32> to vector<32x96xf32>
    %cst_16 = arith.constant dense<0.000000e+00> : vector<16x96xf32>
    %20 = tpu.matmul %15, %19, %cst_16 {dimension_numbers = #tpu.dot_dimension_numbers<[1], [0], [0], [1], [0, 0, 1, 1], [], []>} : vector<16x32xf32>, vector<32x96xf32>, vector<16x96xf32> -> vector<16x96xf32>
    %c0_17 = arith.constant 0 : index
    %c0_18 = arith.constant 0 : index
    %c0_19 = arith.constant 0 : index
    %21 = vector.load %arg5[%c0_17, %c0_18, %c0_19] : memref<2x1x96xf32, #tpu.memory_space<vmem>>, vector<1x1x96xf32>
    %22 = vector.shape_cast %21 : vector<1x1x96xf32> to vector<1x96xf32>
    %23 = vector.broadcast %22 : vector<1x96xf32> to vector<16x96xf32>
    %24 = arith.addf %20, %23 : vector<16x96xf32>
    %c0_20 = arith.constant 0 : index
    %c0_21 = arith.constant 0 : index
    %c0_22 = arith.constant 0 : index
    %25 = vector.load %arg6[%c0_20, %c0_21, %c0_22] : memref<2x32x32xf32, #tpu.memory_space<vmem>>, vector<1x32x32xf32>
    %26 = vector.shape_cast %25 : vector<1x32x32xf32> to vector<32x32xf32>
    %27 = vector.extract_strided_slice %17 {offsets = [0, 0], sizes = [1, 32], strides = [1, 1]} : vector<6x32xf32> to vector<1x32xf32>
    %28 = vector.extract_strided_slice %24 {offsets = [0, 0], sizes = [16, 8], strides = [1, 1]} : vector<16x96xf32> to vector<16x8xf32>
    %29 = vector.shape_cast %28 : vector<16x8xf32> to vector<2x8x8xf32>
    %30 = vector.extract_strided_slice %24 {offsets = [0, 32], sizes = [16, 8], strides = [1, 1]} : vector<16x96xf32> to vector<16x8xf32>
    %31 = vector.shape_cast %30 : vector<16x8xf32> to vector<2x8x8xf32>
    %32 = vector.extract_strided_slice %24 {offsets = [0, 64], sizes = [16, 8], strides = [1, 1]} : vector<16x96xf32> to vector<16x8xf32>
    %33 = vector.shape_cast %32 : vector<16x8xf32> to vector<2x8x8xf32>
    "tpu.trace_start"() <{level = 10 : i32, message = "bqd,bkd->bqk"}> : () -> ()
    %cst_23 = arith.constant dense<0.000000e+00> : vector<2x8x8xf32>
    %34 = tpu.matmul %29, %31, %cst_23 {dimension_numbers = #tpu.dot_dimension_numbers<[2], [2], [1], [1], [0, 0, 0, 1, 1, 1], [0], [0]>} : vector<2x8x8xf32>, vector<2x8x8xf32>, vector<2x8x8xf32> -> vector<2x8x8xf32>
    "tpu.trace_stop"() : () -> ()
    %35 = vector.broadcast %1 : vector<2x1x8xf32> to vector<2x8x8xf32>
    %36 = arith.addf %34, %35 : vector<2x8x8xf32>
    %37 = math.exp %36 : vector<2x8x8xf32>
    %cst_24 = arith.constant dense<0.000000e+00> : vector<2x8xf32>
    %38 = vector.multi_reduction <add>, %37, %cst_24 [2] : vector<2x8x8xf32> to vector<2x8xf32>
    %39 = vector.shape_cast %38 : vector<2x8xf32> to vector<2x8x1xf32>
    %40 = tpu.reciprocal %39 {approx = true} : vector<2x8x1xf32> -> vector<2x8x1xf32>
    %41 = vector.broadcast %40 : vector<2x8x1xf32> to vector<2x8x8xf32>
    %42 = arith.mulf %37, %41 : vector<2x8x8xf32>
    "tpu.trace_start"() <{level = 10 : i32, message = "bqk,bkd->bqd"}> : () -> ()
    %cst_25 = arith.constant dense<0.000000e+00> : vector<2x8x8xf32>
    %43 = tpu.matmul %42, %33, %cst_25 {dimension_numbers = #tpu.dot_dimension_numbers<[2], [1], [1], [2], [0, 0, 0, 1, 1, 2], [0], [0]>} : vector<2x8x8xf32>, vector<2x8x8xf32>, vector<2x8x8xf32> -> vector<2x8x8xf32>
    "tpu.trace_stop"() : () -> ()
    %44 = vector.shape_cast %43 : vector<2x8x8xf32> to vector<16x8xf32>
    %45 = vector.extract_strided_slice %26 {offsets = [0, 0], sizes = [8, 32], strides = [1, 1]} : vector<32x32xf32> to vector<8x32xf32>
    %cst_26 = arith.constant dense<0.000000e+00> : vector<16x32xf32>
    %46 = tpu.matmul %44, %45, %cst_26 {dimension_numbers = #tpu.dot_dimension_numbers<[1], [0], [0], [1], [0, 0, 1, 1], [], []>} : vector<16x8xf32>, vector<8x32xf32>, vector<16x32xf32> -> vector<16x32xf32>
    %47 = vector.broadcast %27 : vector<1x32xf32> to vector<16x32xf32>
    %48 = arith.addf %47, %46 : vector<16x32xf32>
    %49 = vector.extract_strided_slice %24 {offsets = [0, 8], sizes = [16, 8], strides = [1, 1]} : vector<16x96xf32> to vector<16x8xf32>
    %50 = vector.shape_cast %49 : vector<16x8xf32> to vector<2x8x8xf32>
    %51 = vector.extract_strided_slice %24 {offsets = [0, 40], sizes = [16, 8], strides = [1, 1]} : vector<16x96xf32> to vector<16x8xf32>
    %52 = vector.shape_cast %51 : vector<16x8xf32> to vector<2x8x8xf32>
    %53 = vector.extract_strided_slice %24 {offsets = [0, 72], sizes = [16, 8], strides = [1, 1]} : vector<16x96xf32> to vector<16x8xf32>
    %54 = vector.shape_cast %53 : vector<16x8xf32> to vector<2x8x8xf32>
    "tpu.trace_start"() <{level = 10 : i32, message = "bqd,bkd->bqk"}> : () -> ()
    %cst_27 = arith.constant dense<0.000000e+00> : vector<2x8x8xf32>
    %55 = tpu.matmul %50, %52, %cst_27 {dimension_numbers = #tpu.dot_dimension_numbers<[2], [2], [1], [1], [0, 0, 0, 1, 1, 1], [0], [0]>} : vector<2x8x8xf32>, vector<2x8x8xf32>, vector<2x8x8xf32> -> vector<2x8x8xf32>
    "tpu.trace_stop"() : () -> ()
    %56 = vector.broadcast %1 : vector<2x1x8xf32> to vector<2x8x8xf32>
    %57 = arith.addf %55, %56 : vector<2x8x8xf32>
    %58 = math.exp %57 : vector<2x8x8xf32>
    %cst_28 = arith.constant dense<0.000000e+00> : vector<2x8xf32>
    %59 = vector.multi_reduction <add>, %58, %cst_28 [2] : vector<2x8x8xf32> to vector<2x8xf32>
    %60 = vector.shape_cast %59 : vector<2x8xf32> to vector<2x8x1xf32>
    %61 = tpu.reciprocal %60 {approx = true} : vector<2x8x1xf32> -> vector<2x8x1xf32>
    %62 = vector.broadcast %61 : vector<2x8x1xf32> to vector<2x8x8xf32>
    %63 = arith.mulf %58, %62 : vector<2x8x8xf32>
    "tpu.trace_start"() <{level = 10 : i32, message = "bqk,bkd->bqd"}> : () -> ()
    %cst_29 = arith.constant dense<0.000000e+00> : vector<2x8x8xf32>
    %64 = tpu.matmul %63, %54, %cst_29 {dimension_numbers = #tpu.dot_dimension_numbers<[2], [1], [1], [2], [0, 0, 0, 1, 1, 2], [0], [0]>} : vector<2x8x8xf32>, vector<2x8x8xf32>, vector<2x8x8xf32> -> vector<2x8x8xf32>
    "tpu.trace_stop"() : () -> ()
    %65 = vector.shape_cast %64 : vector<2x8x8xf32> to vector<16x8xf32>
    %66 = vector.extract_strided_slice %26 {offsets = [8, 0], sizes = [8, 32], strides = [1, 1]} : vector<32x32xf32> to vector<8x32xf32>
    %cst_30 = arith.constant dense<0.000000e+00> : vector<16x32xf32>
    %67 = tpu.matmul %65, %66, %cst_30 {dimension_numbers = #tpu.dot_dimension_numbers<[1], [0], [0], [1], [0, 0, 1, 1], [], []>} : vector<16x8xf32>, vector<8x32xf32>, vector<16x32xf32> -> vector<16x32xf32>
    %68 = arith.addf %48, %67 : vector<16x32xf32>
    %69 = vector.extract_strided_slice %24 {offsets = [0, 16], sizes = [16, 8], strides = [1, 1]} : vector<16x96xf32> to vector<16x8xf32>
    %70 = vector.shape_cast %69 : vector<16x8xf32> to vector<2x8x8xf32>
    %71 = vector.extract_strided_slice %24 {offsets = [0, 48], sizes = [16, 8], strides = [1, 1]} : vector<16x96xf32> to vector<16x8xf32>
    %72 = vector.shape_cast %71 : vector<16x8xf32> to vector<2x8x8xf32>
    %73 = vector.extract_strided_slice %24 {offsets = [0, 80], sizes = [16, 8], strides = [1, 1]} : vector<16x96xf32> to vector<16x8xf32>
    %74 = vector.shape_cast %73 : vector<16x8xf32> to vector<2x8x8xf32>
    "tpu.trace_start"() <{level = 10 : i32, message = "bqd,bkd->bqk"}> : () -> ()
    %cst_31 = arith.constant dense<0.000000e+00> : vector<2x8x8xf32>
    %75 = tpu.matmul %70, %72, %cst_31 {dimension_numbers = #tpu.dot_dimension_numbers<[2], [2], [1], [1], [0, 0, 0, 1, 1, 1], [0], [0]>} : vector<2x8x8xf32>, vector<2x8x8xf32>, vector<2x8x8xf32> -> vector<2x8x8xf32>
    "tpu.trace_stop"() : () -> ()
    %76 = vector.broadcast %1 : vector<2x1x8xf32> to vector<2x8x8xf32>
    %77 = arith.addf %75, %76 : vector<2x8x8xf32>
    %78 = math.exp %77 : vector<2x8x8xf32>
    %cst_32 = arith.constant dense<0.000000e+00> : vector<2x8xf32>
    %79 = vector.multi_reduction <add>, %78, %cst_32 [2] : vector<2x8x8xf32> to vector<2x8xf32>
    %80 = vector.shape_cast %79 : vector<2x8xf32> to vector<2x8x1xf32>
    %81 = tpu.reciprocal %80 {approx = true} : vector<2x8x1xf32> -> vector<2x8x1xf32>
    %82 = vector.broadcast %81 : vector<2x8x1xf32> to vector<2x8x8xf32>
    %83 = arith.mulf %78, %82 : vector<2x8x8xf32>
    "tpu.trace_start"() <{level = 10 : i32, message = "bqk,bkd->bqd"}> : () -> ()
    %cst_33 = arith.constant dense<0.000000e+00> : vector<2x8x8xf32>
    %84 = tpu.matmul %83, %74, %cst_33 {dimension_numbers = #tpu.dot_dimension_numbers<[2], [1], [1], [2], [0, 0, 0, 1, 1, 2], [0], [0]>} : vector<2x8x8xf32>, vector<2x8x8xf32>, vector<2x8x8xf32> -> vector<2x8x8xf32>
    "tpu.trace_stop"() : () -> ()
    %85 = vector.shape_cast %84 : vector<2x8x8xf32> to vector<16x8xf32>
    %86 = vector.extract_strided_slice %26 {offsets = [16, 0], sizes = [8, 32], strides = [1, 1]} : vector<32x32xf32> to vector<8x32xf32>
    %cst_34 = arith.constant dense<0.000000e+00> : vector<16x32xf32>
    %87 = tpu.matmul %85, %86, %cst_34 {dimension_numbers = #tpu.dot_dimension_numbers<[1], [0], [0], [1], [0, 0, 1, 1], [], []>} : vector<16x8xf32>, vector<8x32xf32>, vector<16x32xf32> -> vector<16x32xf32>
    %88 = arith.addf %68, %87 : vector<16x32xf32>
    %89 = vector.extract_strided_slice %24 {offsets = [0, 24], sizes = [16, 8], strides = [1, 1]} : vector<16x96xf32> to vector<16x8xf32>
    %90 = vector.shape_cast %89 : vector<16x8xf32> to vector<2x8x8xf32>
    %91 = vector.extract_strided_slice %24 {offsets = [0, 56], sizes = [16, 8], strides = [1, 1]} : vector<16x96xf32> to vector<16x8xf32>
    %92 = vector.shape_cast %91 : vector<16x8xf32> to vector<2x8x8xf32>
    %93 = vector.extract_strided_slice %24 {offsets = [0, 88], sizes = [16, 8], strides = [1, 1]} : vector<16x96xf32> to vector<16x8xf32>
    %94 = vector.shape_cast %93 : vector<16x8xf32> to vector<2x8x8xf32>
    "tpu.trace_start"() <{level = 10 : i32, message = "bqd,bkd->bqk"}> : () -> ()
    %cst_35 = arith.constant dense<0.000000e+00> : vector<2x8x8xf32>
    %95 = tpu.matmul %90, %92, %cst_35 {dimension_numbers = #tpu.dot_dimension_numbers<[2], [2], [1], [1], [0, 0, 0, 1, 1, 1], [0], [0]>} : vector<2x8x8xf32>, vector<2x8x8xf32>, vector<2x8x8xf32> -> vector<2x8x8xf32>
    "tpu.trace_stop"() : () -> ()
    %96 = vector.broadcast %1 : vector<2x1x8xf32> to vector<2x8x8xf32>
    %97 = arith.addf %95, %96 : vector<2x8x8xf32>
    %98 = math.exp %97 : vector<2x8x8xf32>
    %cst_36 = arith.constant dense<0.000000e+00> : vector<2x8xf32>
    %99 = vector.multi_reduction <add>, %98, %cst_36 [2] : vector<2x8x8xf32> to vector<2x8xf32>
    %100 = vector.shape_cast %99 : vector<2x8xf32> to vector<2x8x1xf32>
    %101 = tpu.reciprocal %100 {approx = true} : vector<2x8x1xf32> -> vector<2x8x1xf32>
    %102 = vector.broadcast %101 : vector<2x8x1xf32> to vector<2x8x8xf32>
    %103 = arith.mulf %98, %102 : vector<2x8x8xf32>
    "tpu.trace_start"() <{level = 10 : i32, message = "bqk,bkd->bqd"}> : () -> ()
    %cst_37 = arith.constant dense<0.000000e+00> : vector<2x8x8xf32>
    %104 = tpu.matmul %103, %94, %cst_37 {dimension_numbers = #tpu.dot_dimension_numbers<[2], [1], [1], [2], [0, 0, 0, 1, 1, 2], [0], [0]>} : vector<2x8x8xf32>, vector<2x8x8xf32>, vector<2x8x8xf32> -> vector<2x8x8xf32>
    "tpu.trace_stop"() : () -> ()
    %105 = vector.shape_cast %104 : vector<2x8x8xf32> to vector<16x8xf32>
    %106 = vector.extract_strided_slice %26 {offsets = [24, 0], sizes = [8, 32], strides = [1, 1]} : vector<32x32xf32> to vector<8x32xf32>
    %cst_38 = arith.constant dense<0.000000e+00> : vector<16x32xf32>
    %107 = tpu.matmul %105, %106, %cst_38 {dimension_numbers = #tpu.dot_dimension_numbers<[1], [0], [0], [1], [0, 0, 1, 1], [], []>} : vector<16x8xf32>, vector<8x32xf32>, vector<16x32xf32> -> vector<16x32xf32>
    %108 = arith.addf %88, %107 : vector<16x32xf32>
    %109 = arith.addf %15, %108 : vector<16x32xf32>
    %110 = vector.extract_strided_slice %17 {offsets = [1, 0], sizes = [1, 32], strides = [1, 1]} : vector<6x32xf32> to vector<1x32xf32>
    %111 = vector.extract_strided_slice %17 {offsets = [2, 0], sizes = [1, 32], strides = [1, 1]} : vector<6x32xf32> to vector<1x32xf32>
    %cst_39 = arith.constant dense<0.000000e+00> : vector<16xf32>
    %112 = vector.multi_reduction <add>, %109, %cst_39 [1] : vector<16x32xf32> to vector<16xf32>
    %113 = vector.shape_cast %112 : vector<16xf32> to vector<16x1xf32>
    %cst_40 = arith.constant 3.200000e+01 : f32
    %114 = vector.broadcast %cst_40 : f32 to vector<16x1xf32>
    %115 = arith.divf %113, %114 : vector<16x1xf32>
    %116 = vector.broadcast %115 : vector<16x1xf32> to vector<16x32xf32>
    %117 = arith.subf %109, %116 : vector<16x32xf32>
    %118 = arith.mulf %117, %117 : vector<16x32xf32>
    %cst_41 = arith.constant dense<0.000000e+00> : vector<16xf32>
    %119 = vector.multi_reduction <add>, %118, %cst_41 [1] : vector<16x32xf32> to vector<16xf32>
    %120 = vector.shape_cast %119 : vector<16xf32> to vector<16x1xf32>
    %cst_42 = arith.constant 3.200000e+01 : f32
    %121 = vector.broadcast %cst_42 : f32 to vector<16x1xf32>
    %122 = arith.divf %120, %121 : vector<16x1xf32>
    %123 = vector.broadcast %115 : vector<16x1xf32> to vector<16x32xf32>
    %124 = arith.subf %109, %123 : vector<16x32xf32>
    %cst_43 = arith.constant 9.99999974E-6 : f32
    %125 = vector.broadcast %cst_43 : f32 to vector<16x1xf32>
    %126 = arith.addf %122, %125 : vector<16x1xf32>
    %127 = math.rsqrt %126 : vector<16x1xf32>
    %128 = vector.broadcast %127 : vector<16x1xf32> to vector<16x32xf32>
    %129 = arith.mulf %124, %128 : vector<16x32xf32>
    %130 = vector.broadcast %110 : vector<1x32xf32> to vector<16x32xf32>
    %131 = arith.mulf %129, %130 : vector<16x32xf32>
    %132 = vector.broadcast %111 : vector<1x32xf32> to vector<16x32xf32>
    %133 = arith.addf %131, %132 : vector<16x32xf32>
    %c0_44 = arith.constant 0 : index
    %c0_45 = arith.constant 0 : index
    %c0_46 = arith.constant 0 : index
    %134 = vector.load %arg7[%c0_44, %c0_45, %c0_46] : memref<2x32x64xf32, #tpu.memory_space<vmem>>, vector<1x32x64xf32>
    %135 = vector.shape_cast %134 : vector<1x32x64xf32> to vector<32x64xf32>
    %cst_47 = arith.constant dense<0.000000e+00> : vector<16x64xf32>
    %136 = tpu.matmul %133, %135, %cst_47 {dimension_numbers = #tpu.dot_dimension_numbers<[1], [0], [0], [1], [0, 0, 1, 1], [], []>} : vector<16x32xf32>, vector<32x64xf32>, vector<16x64xf32> -> vector<16x64xf32>
    %c0_48 = arith.constant 0 : index
    %c0_49 = arith.constant 0 : index
    %c0_50 = arith.constant 0 : index
    %137 = vector.load %arg8[%c0_48, %c0_49, %c0_50] : memref<2x1x64xf32, #tpu.memory_space<vmem>>, vector<1x1x64xf32>
    %138 = vector.shape_cast %137 : vector<1x1x64xf32> to vector<1x64xf32>
    %139 = vector.broadcast %138 : vector<1x64xf32> to vector<16x64xf32>
    %140 = arith.addf %136, %139 : vector<16x64xf32>
    %cst_51 = arith.constant 0.000000e+00 : f32
    %141 = vector.broadcast %cst_51 : f32 to vector<16x64xf32>
    %142 = arith.maximumf %140, %141 : vector<16x64xf32>
    %c0_52 = arith.constant 0 : index
    %c0_53 = arith.constant 0 : index
    %c0_54 = arith.constant 0 : index
    %143 = vector.load %arg9[%c0_52, %c0_53, %c0_54] : memref<2x64x32xf32, #tpu.memory_space<vmem>>, vector<1x64x32xf32>
    %144 = vector.shape_cast %143 : vector<1x64x32xf32> to vector<64x32xf32>
    %cst_55 = arith.constant dense<0.000000e+00> : vector<16x32xf32>
    %145 = tpu.matmul %142, %144, %cst_55 {dimension_numbers = #tpu.dot_dimension_numbers<[1], [0], [0], [1], [0, 0, 1, 1], [], []>} : vector<16x64xf32>, vector<64x32xf32>, vector<16x32xf32> -> vector<16x32xf32>
    %146 = vector.extract_strided_slice %17 {offsets = [3, 0], sizes = [1, 32], strides = [1, 1]} : vector<6x32xf32> to vector<1x32xf32>
    %147 = vector.broadcast %146 : vector<1x32xf32> to vector<16x32xf32>
    %148 = arith.addf %145, %147 : vector<16x32xf32>
    %149 = arith.addf %133, %148 : vector<16x32xf32>
    %150 = vector.extract_strided_slice %17 {offsets = [4, 0], sizes = [1, 32], strides = [1, 1]} : vector<6x32xf32> to vector<1x32xf32>
    %151 = vector.extract_strided_slice %17 {offsets = [5, 0], sizes = [1, 32], strides = [1, 1]} : vector<6x32xf32> to vector<1x32xf32>
    %cst_56 = arith.constant dense<0.000000e+00> : vector<16xf32>
    %152 = vector.multi_reduction <add>, %149, %cst_56 [1] : vector<16x32xf32> to vector<16xf32>
    %153 = vector.shape_cast %152 : vector<16xf32> to vector<16x1xf32>
    %cst_57 = arith.constant 3.200000e+01 : f32
    %154 = vector.broadcast %cst_57 : f32 to vector<16x1xf32>
    %155 = arith.divf %153, %154 : vector<16x1xf32>
    %156 = vector.broadcast %155 : vector<16x1xf32> to vector<16x32xf32>
    %157 = arith.subf %149, %156 : vector<16x32xf32>
    %158 = arith.mulf %157, %157 : vector<16x32xf32>
    %cst_58 = arith.constant dense<0.000000e+00> : vector<16xf32>
    %159 = vector.multi_reduction <add>, %158, %cst_58 [1] : vector<16x32xf32> to vector<16xf32>
    %160 = vector.shape_cast %159 : vector<16xf32> to vector<16x1xf32>
    %cst_59 = arith.constant 3.200000e+01 : f32
    %161 = vector.broadcast %cst_59 : f32 to vector<16x1xf32>
    %162 = arith.divf %160, %161 : vector<16x1xf32>
    %163 = vector.broadcast %155 : vector<16x1xf32> to vector<16x32xf32>
    %164 = arith.subf %149, %163 : vector<16x32xf32>
    %cst_60 = arith.constant 9.99999974E-6 : f32
    %165 = vector.broadcast %cst_60 : f32 to vector<16x1xf32>
    %166 = arith.addf %162, %165 : vector<16x1xf32>
    %167 = math.rsqrt %166 : vector<16x1xf32>
    %168 = vector.broadcast %167 : vector<16x1xf32> to vector<16x32xf32>
    %169 = arith.mulf %164, %168 : vector<16x32xf32>
    %170 = vector.broadcast %150 : vector<1x32xf32> to vector<16x32xf32>
    %171 = arith.mulf %169, %170 : vector<16x32xf32>
    %172 = vector.broadcast %151 : vector<1x32xf32> to vector<16x32xf32>
    %173 = arith.addf %171, %172 : vector<16x32xf32>
    %c1 = arith.constant 1 : index
    %c0_61 = arith.constant 0 : index
    %c0_62 = arith.constant 0 : index
    %174 = vector.load %arg10[%c1, %c0_61, %c0_62] : memref<2x6x32xf32, #tpu.memory_space<vmem>>, vector<1x6x32xf32>
    %175 = vector.shape_cast %174 : vector<1x6x32xf32> to vector<6x32xf32>
    %c1_63 = arith.constant 1 : index
    %c0_64 = arith.constant 0 : index
    %c0_65 = arith.constant 0 : index
    %176 = vector.load %arg4[%c1_63, %c0_64, %c0_65] : memref<2x32x96xf32, #tpu.memory_space<vmem>>, vector<1x32x96xf32>
    %177 = vector.shape_cast %176 : vector<1x32x96xf32> to vector<32x96xf32>
    %cst_66 = arith.constant dense<0.000000e+00> : vector<16x96xf32>
    %178 = tpu.matmul %173, %177, %cst_66 {dimension_numbers = #tpu.dot_dimension_numbers<[1], [0], [0], [1], [0, 0, 1, 1], [], []>} : vector<16x32xf32>, vector<32x96xf32>, vector<16x96xf32> -> vector<16x96xf32>
    %c1_67 = arith.constant 1 : index
    %c0_68 = arith.constant 0 : index
    %c0_69 = arith.constant 0 : index
    %179 = vector.load %arg5[%c1_67, %c0_68, %c0_69] : memref<2x1x96xf32, #tpu.memory_space<vmem>>, vector<1x1x96xf32>
    %180 = vector.shape_cast %179 : vector<1x1x96xf32> to vector<1x96xf32>
    %181 = vector.broadcast %180 : vector<1x96xf32> to vector<16x96xf32>
    %182 = arith.addf %178, %181 : vector<16x96xf32>
    %c1_70 = arith.constant 1 : index
    %c0_71 = arith.constant 0 : index
    %c0_72 = arith.constant 0 : index
    %183 = vector.load %arg6[%c1_70, %c0_71, %c0_72] : memref<2x32x32xf32, #tpu.memory_space<vmem>>, vector<1x32x32xf32>
    %184 = vector.shape_cast %183 : vector<1x32x32xf32> to vector<32x32xf32>
    %185 = vector.extract_strided_slice %175 {offsets = [0, 0], sizes = [1, 32], strides = [1, 1]} : vector<6x32xf32> to vector<1x32xf32>
    %186 = vector.extract_strided_slice %182 {offsets = [0, 0], sizes = [16, 8], strides = [1, 1]} : vector<16x96xf32> to vector<16x8xf32>
    %187 = vector.shape_cast %186 : vector<16x8xf32> to vector<2x8x8xf32>
    %188 = vector.extract_strided_slice %182 {offsets = [0, 32], sizes = [16, 8], strides = [1, 1]} : vector<16x96xf32> to vector<16x8xf32>
    %189 = vector.shape_cast %188 : vector<16x8xf32> to vector<2x8x8xf32>
    %190 = vector.extract_strided_slice %182 {offsets = [0, 64], sizes = [16, 8], strides = [1, 1]} : vector<16x96xf32> to vector<16x8xf32>
    %191 = vector.shape_cast %190 : vector<16x8xf32> to vector<2x8x8xf32>
    "tpu.trace_start"() <{level = 10 : i32, message = "bqd,bkd->bqk"}> : () -> ()
    %cst_73 = arith.constant dense<0.000000e+00> : vector<2x8x8xf32>
    %192 = tpu.matmul %187, %189, %cst_73 {dimension_numbers = #tpu.dot_dimension_numbers<[2], [2], [1], [1], [0, 0, 0, 1, 1, 1], [0], [0]>} : vector<2x8x8xf32>, vector<2x8x8xf32>, vector<2x8x8xf32> -> vector<2x8x8xf32>
    "tpu.trace_stop"() : () -> ()
    %193 = vector.broadcast %1 : vector<2x1x8xf32> to vector<2x8x8xf32>
    %194 = arith.addf %192, %193 : vector<2x8x8xf32>
    %195 = math.exp %194 : vector<2x8x8xf32>
    %cst_74 = arith.constant dense<0.000000e+00> : vector<2x8xf32>
    %196 = vector.multi_reduction <add>, %195, %cst_74 [2] : vector<2x8x8xf32> to vector<2x8xf32>
    %197 = vector.shape_cast %196 : vector<2x8xf32> to vector<2x8x1xf32>
    %198 = tpu.reciprocal %197 {approx = true} : vector<2x8x1xf32> -> vector<2x8x1xf32>
    %199 = vector.broadcast %198 : vector<2x8x1xf32> to vector<2x8x8xf32>
    %200 = arith.mulf %195, %199 : vector<2x8x8xf32>
    "tpu.trace_start"() <{level = 10 : i32, message = "bqk,bkd->bqd"}> : () -> ()
    %cst_75 = arith.constant dense<0.000000e+00> : vector<2x8x8xf32>
    %201 = tpu.matmul %200, %191, %cst_75 {dimension_numbers = #tpu.dot_dimension_numbers<[2], [1], [1], [2], [0, 0, 0, 1, 1, 2], [0], [0]>} : vector<2x8x8xf32>, vector<2x8x8xf32>, vector<2x8x8xf32> -> vector<2x8x8xf32>
    "tpu.trace_stop"() : () -> ()
    %202 = vector.shape_cast %201 : vector<2x8x8xf32> to vector<16x8xf32>
    %203 = vector.extract_strided_slice %184 {offsets = [0, 0], sizes = [8, 32], strides = [1, 1]} : vector<32x32xf32> to vector<8x32xf32>
    %cst_76 = arith.constant dense<0.000000e+00> : vector<16x32xf32>
    %204 = tpu.matmul %202, %203, %cst_76 {dimension_numbers = #tpu.dot_dimension_numbers<[1], [0], [0], [1], [0, 0, 1, 1], [], []>} : vector<16x8xf32>, vector<8x32xf32>, vector<16x32xf32> -> vector<16x32xf32>
    %205 = vector.broadcast %185 : vector<1x32xf32> to vector<16x32xf32>
    %206 = arith.addf %205, %204 : vector<16x32xf32>
    %207 = vector.extract_strided_slice %182 {offsets = [0, 8], sizes = [16, 8], strides = [1, 1]} : vector<16x96xf32> to vector<16x8xf32>
    %208 = vector.shape_cast %207 : vector<16x8xf32> to vector<2x8x8xf32>
    %209 = vector.extract_strided_slice %182 {offsets = [0, 40], sizes = [16, 8], strides = [1, 1]} : vector<16x96xf32> to vector<16x8xf32>
    %210 = vector.shape_cast %209 : vector<16x8xf32> to vector<2x8x8xf32>
    %211 = vector.extract_strided_slice %182 {offsets = [0, 72], sizes = [16, 8], strides = [1, 1]} : vector<16x96xf32> to vector<16x8xf32>
    %212 = vector.shape_cast %211 : vector<16x8xf32> to vector<2x8x8xf32>
    "tpu.trace_start"() <{level = 10 : i32, message = "bqd,bkd->bqk"}> : () -> ()
    %cst_77 = arith.constant dense<0.000000e+00> : vector<2x8x8xf32>
    %213 = tpu.matmul %208, %210, %cst_77 {dimension_numbers = #tpu.dot_dimension_numbers<[2], [2], [1], [1], [0, 0, 0, 1, 1, 1], [0], [0]>} : vector<2x8x8xf32>, vector<2x8x8xf32>, vector<2x8x8xf32> -> vector<2x8x8xf32>
    "tpu.trace_stop"() : () -> ()
    %214 = vector.broadcast %1 : vector<2x1x8xf32> to vector<2x8x8xf32>
    %215 = arith.addf %213, %214 : vector<2x8x8xf32>
    %216 = math.exp %215 : vector<2x8x8xf32>
    %cst_78 = arith.constant dense<0.000000e+00> : vector<2x8xf32>
    %217 = vector.multi_reduction <add>, %216, %cst_78 [2] : vector<2x8x8xf32> to vector<2x8xf32>
    %218 = vector.shape_cast %217 : vector<2x8xf32> to vector<2x8x1xf32>
    %219 = tpu.reciprocal %218 {approx = true} : vector<2x8x1xf32> -> vector<2x8x1xf32>
    %220 = vector.broadcast %219 : vector<2x8x1xf32> to vector<2x8x8xf32>
    %221 = arith.mulf %216, %220 : vector<2x8x8xf32>
    "tpu.trace_start"() <{level = 10 : i32, message = "bqk,bkd->bqd"}> : () -> ()
    %cst_79 = arith.constant dense<0.000000e+00> : vector<2x8x8xf32>
    %222 = tpu.matmul %221, %212, %cst_79 {dimension_numbers = #tpu.dot_dimension_numbers<[2], [1], [1], [2], [0, 0, 0, 1, 1, 2], [0], [0]>} : vector<2x8x8xf32>, vector<2x8x8xf32>, vector<2x8x8xf32> -> vector<2x8x8xf32>
    "tpu.trace_stop"() : () -> ()
    %223 = vector.shape_cast %222 : vector<2x8x8xf32> to vector<16x8xf32>
    %224 = vector.extract_strided_slice %184 {offsets = [8, 0], sizes = [8, 32], strides = [1, 1]} : vector<32x32xf32> to vector<8x32xf32>
    %cst_80 = arith.constant dense<0.000000e+00> : vector<16x32xf32>
    %225 = tpu.matmul %223, %224, %cst_80 {dimension_numbers = #tpu.dot_dimension_numbers<[1], [0], [0], [1], [0, 0, 1, 1], [], []>} : vector<16x8xf32>, vector<8x32xf32>, vector<16x32xf32> -> vector<16x32xf32>
    %226 = arith.addf %206, %225 : vector<16x32xf32>
    %227 = vector.extract_strided_slice %182 {offsets = [0, 16], sizes = [16, 8], strides = [1, 1]} : vector<16x96xf32> to vector<16x8xf32>
    %228 = vector.shape_cast %227 : vector<16x8xf32> to vector<2x8x8xf32>
    %229 = vector.extract_strided_slice %182 {offsets = [0, 48], sizes = [16, 8], strides = [1, 1]} : vector<16x96xf32> to vector<16x8xf32>
    %230 = vector.shape_cast %229 : vector<16x8xf32> to vector<2x8x8xf32>
    %231 = vector.extract_strided_slice %182 {offsets = [0, 80], sizes = [16, 8], strides = [1, 1]} : vector<16x96xf32> to vector<16x8xf32>
    %232 = vector.shape_cast %231 : vector<16x8xf32> to vector<2x8x8xf32>
    "tpu.trace_start"() <{level = 10 : i32, message = "bqd,bkd->bqk"}> : () -> ()
    %cst_81 = arith.constant dense<0.000000e+00> : vector<2x8x8xf32>
    %233 = tpu.matmul %228, %230, %cst_81 {dimension_numbers = #tpu.dot_dimension_numbers<[2], [2], [1], [1], [0, 0, 0, 1, 1, 1], [0], [0]>} : vector<2x8x8xf32>, vector<2x8x8xf32>, vector<2x8x8xf32> -> vector<2x8x8xf32>
    "tpu.trace_stop"() : () -> ()
    %234 = vector.broadcast %1 : vector<2x1x8xf32> to vector<2x8x8xf32>
    %235 = arith.addf %233, %234 : vector<2x8x8xf32>
    %236 = math.exp %235 : vector<2x8x8xf32>
    %cst_82 = arith.constant dense<0.000000e+00> : vector<2x8xf32>
    %237 = vector.multi_reduction <add>, %236, %cst_82 [2] : vector<2x8x8xf32> to vector<2x8xf32>
    %238 = vector.shape_cast %237 : vector<2x8xf32> to vector<2x8x1xf32>
    %239 = tpu.reciprocal %238 {approx = true} : vector<2x8x1xf32> -> vector<2x8x1xf32>
    %240 = vector.broadcast %239 : vector<2x8x1xf32> to vector<2x8x8xf32>
    %241 = arith.mulf %236, %240 : vector<2x8x8xf32>
    "tpu.trace_start"() <{level = 10 : i32, message = "bqk,bkd->bqd"}> : () -> ()
    %cst_83 = arith.constant dense<0.000000e+00> : vector<2x8x8xf32>
    %242 = tpu.matmul %241, %232, %cst_83 {dimension_numbers = #tpu.dot_dimension_numbers<[2], [1], [1], [2], [0, 0, 0, 1, 1, 2], [0], [0]>} : vector<2x8x8xf32>, vector<2x8x8xf32>, vector<2x8x8xf32> -> vector<2x8x8xf32>
    "tpu.trace_stop"() : () -> ()
    %243 = vector.shape_cast %242 : vector<2x8x8xf32> to vector<16x8xf32>
    %244 = vector.extract_strided_slice %184 {offsets = [16, 0], sizes = [8, 32], strides = [1, 1]} : vector<32x32xf32> to vector<8x32xf32>
    %cst_84 = arith.constant dense<0.000000e+00> : vector<16x32xf32>
    %245 = tpu.matmul %243, %244, %cst_84 {dimension_numbers = #tpu.dot_dimension_numbers<[1], [0], [0], [1], [0, 0, 1, 1], [], []>} : vector<16x8xf32>, vector<8x32xf32>, vector<16x32xf32> -> vector<16x32xf32>
    %246 = arith.addf %226, %245 : vector<16x32xf32>
    %247 = vector.extract_strided_slice %182 {offsets = [0, 24], sizes = [16, 8], strides = [1, 1]} : vector<16x96xf32> to vector<16x8xf32>
    %248 = vector.shape_cast %247 : vector<16x8xf32> to vector<2x8x8xf32>
    %249 = vector.extract_strided_slice %182 {offsets = [0, 56], sizes = [16, 8], strides = [1, 1]} : vector<16x96xf32> to vector<16x8xf32>
    %250 = vector.shape_cast %249 : vector<16x8xf32> to vector<2x8x8xf32>
    %251 = vector.extract_strided_slice %182 {offsets = [0, 88], sizes = [16, 8], strides = [1, 1]} : vector<16x96xf32> to vector<16x8xf32>
    %252 = vector.shape_cast %251 : vector<16x8xf32> to vector<2x8x8xf32>
    "tpu.trace_start"() <{level = 10 : i32, message = "bqd,bkd->bqk"}> : () -> ()
    %cst_85 = arith.constant dense<0.000000e+00> : vector<2x8x8xf32>
    %253 = tpu.matmul %248, %250, %cst_85 {dimension_numbers = #tpu.dot_dimension_numbers<[2], [2], [1], [1], [0, 0, 0, 1, 1, 1], [0], [0]>} : vector<2x8x8xf32>, vector<2x8x8xf32>, vector<2x8x8xf32> -> vector<2x8x8xf32>
    "tpu.trace_stop"() : () -> ()
    %254 = vector.broadcast %1 : vector<2x1x8xf32> to vector<2x8x8xf32>
    %255 = arith.addf %253, %254 : vector<2x8x8xf32>
    %256 = math.exp %255 : vector<2x8x8xf32>
    %cst_86 = arith.constant dense<0.000000e+00> : vector<2x8xf32>
    %257 = vector.multi_reduction <add>, %256, %cst_86 [2] : vector<2x8x8xf32> to vector<2x8xf32>
    %258 = vector.shape_cast %257 : vector<2x8xf32> to vector<2x8x1xf32>
    %259 = tpu.reciprocal %258 {approx = true} : vector<2x8x1xf32> -> vector<2x8x1xf32>
    %260 = vector.broadcast %259 : vector<2x8x1xf32> to vector<2x8x8xf32>
    %261 = arith.mulf %256, %260 : vector<2x8x8xf32>
    "tpu.trace_start"() <{level = 10 : i32, message = "bqk,bkd->bqd"}> : () -> ()
    %cst_87 = arith.constant dense<0.000000e+00> : vector<2x8x8xf32>
    %262 = tpu.matmul %261, %252, %cst_87 {dimension_numbers = #tpu.dot_dimension_numbers<[2], [1], [1], [2], [0, 0, 0, 1, 1, 2], [0], [0]>} : vector<2x8x8xf32>, vector<2x8x8xf32>, vector<2x8x8xf32> -> vector<2x8x8xf32>
    "tpu.trace_stop"() : () -> ()
    %263 = vector.shape_cast %262 : vector<2x8x8xf32> to vector<16x8xf32>
    %264 = vector.extract_strided_slice %184 {offsets = [24, 0], sizes = [8, 32], strides = [1, 1]} : vector<32x32xf32> to vector<8x32xf32>
    %cst_88 = arith.constant dense<0.000000e+00> : vector<16x32xf32>
    %265 = tpu.matmul %263, %264, %cst_88 {dimension_numbers = #tpu.dot_dimension_numbers<[1], [0], [0], [1], [0, 0, 1, 1], [], []>} : vector<16x8xf32>, vector<8x32xf32>, vector<16x32xf32> -> vector<16x32xf32>
    %266 = arith.addf %246, %265 : vector<16x32xf32>
    %267 = arith.addf %173, %266 : vector<16x32xf32>
    %268 = vector.extract_strided_slice %175 {offsets = [1, 0], sizes = [1, 32], strides = [1, 1]} : vector<6x32xf32> to vector<1x32xf32>
    %269 = vector.extract_strided_slice %175 {offsets = [2, 0], sizes = [1, 32], strides = [1, 1]} : vector<6x32xf32> to vector<1x32xf32>
    %cst_89 = arith.constant dense<0.000000e+00> : vector<16xf32>
    %270 = vector.multi_reduction <add>, %267, %cst_89 [1] : vector<16x32xf32> to vector<16xf32>
    %271 = vector.shape_cast %270 : vector<16xf32> to vector<16x1xf32>
    %cst_90 = arith.constant 3.200000e+01 : f32
    %272 = vector.broadcast %cst_90 : f32 to vector<16x1xf32>
    %273 = arith.divf %271, %272 : vector<16x1xf32>
    %274 = vector.broadcast %273 : vector<16x1xf32> to vector<16x32xf32>
    %275 = arith.subf %267, %274 : vector<16x32xf32>
    %276 = arith.mulf %275, %275 : vector<16x32xf32>
    %cst_91 = arith.constant dense<0.000000e+00> : vector<16xf32>
    %277 = vector.multi_reduction <add>, %276, %cst_91 [1] : vector<16x32xf32> to vector<16xf32>
    %278 = vector.shape_cast %277 : vector<16xf32> to vector<16x1xf32>
    %cst_92 = arith.constant 3.200000e+01 : f32
    %279 = vector.broadcast %cst_92 : f32 to vector<16x1xf32>
    %280 = arith.divf %278, %279 : vector<16x1xf32>
    %281 = vector.broadcast %273 : vector<16x1xf32> to vector<16x32xf32>
    %282 = arith.subf %267, %281 : vector<16x32xf32>
    %cst_93 = arith.constant 9.99999974E-6 : f32
    %283 = vector.broadcast %cst_93 : f32 to vector<16x1xf32>
    %284 = arith.addf %280, %283 : vector<16x1xf32>
    %285 = math.rsqrt %284 : vector<16x1xf32>
    %286 = vector.broadcast %285 : vector<16x1xf32> to vector<16x32xf32>
    %287 = arith.mulf %282, %286 : vector<16x32xf32>
    %288 = vector.broadcast %268 : vector<1x32xf32> to vector<16x32xf32>
    %289 = arith.mulf %287, %288 : vector<16x32xf32>
    %290 = vector.broadcast %269 : vector<1x32xf32> to vector<16x32xf32>
    %291 = arith.addf %289, %290 : vector<16x32xf32>
    %c1_94 = arith.constant 1 : index
    %c0_95 = arith.constant 0 : index
    %c0_96 = arith.constant 0 : index
    %292 = vector.load %arg7[%c1_94, %c0_95, %c0_96] : memref<2x32x64xf32, #tpu.memory_space<vmem>>, vector<1x32x64xf32>
    %293 = vector.shape_cast %292 : vector<1x32x64xf32> to vector<32x64xf32>
    %cst_97 = arith.constant dense<0.000000e+00> : vector<16x64xf32>
    %294 = tpu.matmul %291, %293, %cst_97 {dimension_numbers = #tpu.dot_dimension_numbers<[1], [0], [0], [1], [0, 0, 1, 1], [], []>} : vector<16x32xf32>, vector<32x64xf32>, vector<16x64xf32> -> vector<16x64xf32>
    %c1_98 = arith.constant 1 : index
    %c0_99 = arith.constant 0 : index
    %c0_100 = arith.constant 0 : index
    %295 = vector.load %arg8[%c1_98, %c0_99, %c0_100] : memref<2x1x64xf32, #tpu.memory_space<vmem>>, vector<1x1x64xf32>
    %296 = vector.shape_cast %295 : vector<1x1x64xf32> to vector<1x64xf32>
    %297 = vector.broadcast %296 : vector<1x64xf32> to vector<16x64xf32>
    %298 = arith.addf %294, %297 : vector<16x64xf32>
    %cst_101 = arith.constant 0.000000e+00 : f32
    %299 = vector.broadcast %cst_101 : f32 to vector<16x64xf32>
    %300 = arith.maximumf %298, %299 : vector<16x64xf32>
    %c1_102 = arith.constant 1 : index
    %c0_103 = arith.constant 0 : index
    %c0_104 = arith.constant 0 : index
    %301 = vector.load %arg9[%c1_102, %c0_103, %c0_104] : memref<2x64x32xf32, #tpu.memory_space<vmem>>, vector<1x64x32xf32>
    %302 = vector.shape_cast %301 : vector<1x64x32xf32> to vector<64x32xf32>
    %cst_105 = arith.constant dense<0.000000e+00> : vector<16x32xf32>
    %303 = tpu.matmul %300, %302, %cst_105 {dimension_numbers = #tpu.dot_dimension_numbers<[1], [0], [0], [1], [0, 0, 1, 1], [], []>} : vector<16x64xf32>, vector<64x32xf32>, vector<16x32xf32> -> vector<16x32xf32>
    %304 = vector.extract_strided_slice %175 {offsets = [3, 0], sizes = [1, 32], strides = [1, 1]} : vector<6x32xf32> to vector<1x32xf32>
    %305 = vector.broadcast %304 : vector<1x32xf32> to vector<16x32xf32>
    %306 = arith.addf %303, %305 : vector<16x32xf32>
    %307 = arith.addf %291, %306 : vector<16x32xf32>
    %308 = vector.extract_strided_slice %175 {offsets = [4, 0], sizes = [1, 32], strides = [1, 1]} : vector<6x32xf32> to vector<1x32xf32>
    %309 = vector.extract_strided_slice %175 {offsets = [5, 0], sizes = [1, 32], strides = [1, 1]} : vector<6x32xf32> to vector<1x32xf32>
    %cst_106 = arith.constant dense<0.000000e+00> : vector<16xf32>
    %310 = vector.multi_reduction <add>, %307, %cst_106 [1] : vector<16x32xf32> to vector<16xf32>
    %311 = vector.shape_cast %310 : vector<16xf32> to vector<16x1xf32>
    %cst_107 = arith.constant 3.200000e+01 : f32
    %312 = vector.broadcast %cst_107 : f32 to vector<16x1xf32>
    %313 = arith.divf %311, %312 : vector<16x1xf32>
    %314 = vector.broadcast %313 : vector<16x1xf32> to vector<16x32xf32>
    %315 = arith.subf %307, %314 : vector<16x32xf32>
    %316 = arith.mulf %315, %315 : vector<16x32xf32>
    %cst_108 = arith.constant dense<0.000000e+00> : vector<16xf32>
    %317 = vector.multi_reduction <add>, %316, %cst_108 [1] : vector<16x32xf32> to vector<16xf32>
    %318 = vector.shape_cast %317 : vector<16xf32> to vector<16x1xf32>
    %cst_109 = arith.constant 3.200000e+01 : f32
    %319 = vector.broadcast %cst_109 : f32 to vector<16x1xf32>
    %320 = arith.divf %318, %319 : vector<16x1xf32>
    %321 = vector.broadcast %313 : vector<16x1xf32> to vector<16x32xf32>
    %322 = arith.subf %307, %321 : vector<16x32xf32>
    %cst_110 = arith.constant 9.99999974E-6 : f32
    %323 = vector.broadcast %cst_110 : f32 to vector<16x1xf32>
    %324 = arith.addf %320, %323 : vector<16x1xf32>
    %325 = math.rsqrt %324 : vector<16x1xf32>
    %326 = vector.broadcast %325 : vector<16x1xf32> to vector<16x32xf32>
    %327 = arith.mulf %322, %326 : vector<16x32xf32>
    %328 = vector.broadcast %308 : vector<1x32xf32> to vector<16x32xf32>
    %329 = arith.mulf %327, %328 : vector<16x32xf32>
    %330 = vector.broadcast %309 : vector<1x32xf32> to vector<16x32xf32>
    %331 = arith.addf %329, %330 : vector<16x32xf32>
    %332 = vector.shape_cast %331 : vector<16x32xf32> to vector<2x8x32xf32>
    %333 = vector.extract_strided_slice %332 {offsets = [0, 0, 0], sizes = [2, 1, 32], strides = [1, 1, 1]} : vector<2x8x32xf32> to vector<2x1x32xf32>
    %334 = vector.shape_cast %333 : vector<2x1x32xf32> to vector<2x32xf32>
    %c0_111 = arith.constant 0 : index
    %c0_112 = arith.constant 0 : index
    %335 = vector.load %arg11[%c0_111, %c0_112] : memref<32x128xf32, #tpu.memory_space<vmem>>, vector<32x128xf32>
    %cst_113 = arith.constant dense<0.000000e+00> : vector<2x128xf32>
    %336 = tpu.matmul %334, %335, %cst_113 {dimension_numbers = #tpu.dot_dimension_numbers<[1], [0], [0], [1], [0, 0, 1, 1], [], []>} : vector<2x32xf32>, vector<32x128xf32>, vector<2x128xf32> -> vector<2x128xf32>
    %c0_114 = arith.constant 0 : index
    %c0_115 = arith.constant 0 : index
    %337 = vector.load %arg12[%c0_114, %c0_115] : memref<1x128xf32, #tpu.memory_space<vmem>>, vector<1x128xf32>
    %338 = vector.broadcast %337 : vector<1x128xf32> to vector<2x128xf32>
    %339 = arith.addf %336, %338 : vector<2x128xf32>
    %c0_116 = arith.constant 0 : index
    %c0_117 = arith.constant 0 : index
    %340 = vector.load %arg13[%c0_116, %c0_117] : memref<2x128xf32, #tpu.memory_space<vmem>>, vector<2x128xf32>
    tpu.vector_store %arg13[%c0_116, %c0_117], %339 {strides = array<i32>} : memref<2x128xf32, #tpu.memory_space<vmem>>, vector<2x128xf32>,
    return
  }
}

</mosaic_0001>

<bundles_post_ra>
// kernel: forward.1
= control target key start
LH: loop header
LB: loop body
LE: loop exit
PB: predicated region body
PF: predicated region fallthrough
CT: control target
= control target key end

     0   :  { %18 = vsyncpa [#allocation3], 0  ;;  %s5741_s0 = inlined_call_operand.vmem [shape: s32[16,1], index: 0, kind: input, shape index: {}]   ;;  %s5742_s1 = inlined_call_operand.vmem [shape: f32[2,1,8], index: 1, kind: input, shape index: {}]   ;;  %s5743_s2 = inlined_call_operand.hbm [shape: f32[32,32], index: 2, kind: input, shape index: {}]   ;;  %s5744_s3 = inlined_call_operand.vmem [shape: f32[8,32], index: 3, kind: input, shape index: {}]   ;;  %s5745_s4 = inlined_call_operand.vmem [shape: f32[2,32,96], index: 4, kind: input, shape index: {}]   ;;  %s5746_s5 = inlined_call_operand.vmem [shape: f32[2,1,96], index: 5, kind: input, shape index: {}]   ;;  %s5747_s6 = inlined_call_operand.vmem [shape: f32[2,32,32], index: 6, kind: input, shape index: {}]   ;;  %s5748_s7 = inlined_call_operand.vmem [shape: f32[2,32,64], index: 7, kind: input, shape index: {}]   ;;  %s5749_s8 = inlined_call_operand.vmem [shape: f32[2,1,64], index: 8, kind: input, shape index: {}]   ;;  %s5750_s9 = inlined_call_operand.vmem [shape: f32[2,64,32], index: 9, kind: input, shape index: {}]   ;;  %s5751_s10 = inlined_call_operand.vmem [shape: f32[2,6,32], index: 10, kind: input, shape index: {}]   ;;  %s5752_s11 = inlined_call_operand.hbm [shape: f32[32,128], index: 11, kind: input, shape index: {}]   ;;  %s5753_s12 = inlined_call_operand.vmem [shape: f32[1,128], index: 12, kind: input, shape index: {}]   ;;  %s5754_s13 = inlined_call_operand.vmem [shape: f32[2,128], index: 13, kind: output, shape index: {}]  }
   0x1   :  { %19 = vsyncpa [#allocation5], 0  ;;  %s5066_s25 = smov [#allocation2]   ;;  %s5018_s29 = scalar_lea.hbm %s5743_s2, 512 }
   0x2   :  { %s29_s26 = sshll.u32 %s5066_s25, 4  ;;  %p5019_p0 = scmp.ne.s32.totalorder %s5743_s2, %s5018_s29  ;;  %s30_s26 = int_to_ptr.vmem [resolvable:$true] %s29_s26 }
   0x3   :  { %p5022_p1 = scmp.lt.u32.totalorder %s5018_s29, %s5743_s2 }
   0x5   :  { %p5024_p2 = pnand %p5022_p1, %p5019_p0 }
   0x7   :  { %5027 = shalt.err (!%p5024_p2)
}
   0x8   :  { %s5028_s17 = scalar_lea.vmem %s30_s26, 512  ;;  %p5033_p4 = scmp.lt.s32.totalorder %s30_s26, %s30_s26 }
   0x9   :  { %p5029_p3 = scmp.ne.s32.totalorder %s30_s26, %s5028_s17  ;;  %p5034_p5 = scmp.lt.s32.totalorder %s5028_s17, %s5028_s17 }
   0xb   :  { %p5035_p6 = por %p5034_p5, %p5033_p4 }
   0xd   :  { %p5036_p7 = pnand %p5035_p6, %p5029_p3 }
   0xf   :  { %5039 = shalt.err (!%p5036_p7)
}
  0x10   :  { %s5067_s18 = smov 128   ;;  %s5068_s19 = smov 8  }
  0x11   :  { %35 = dma.hbm_to_vmem [thread:$0]  %s5743_s2, 512, %s30_s26, [#allocation3], %s5067_s18, %s5067_s18, %s5068_s19  }
  0x12   :  { %s5069_s22 = smov [#allocation4]   ;;  %s5040_s27 = scalar_lea.hbm %s5752_s11, 512 }
  0x13   :  { %s57_s23 = sshll.u32 %s5069_s22, 4  ;;  %p5041_p8 = scmp.ne.s32.totalorder %s5752_s11, %s5040_s27  ;;  %s58_s23 = int_to_ptr.vmem [resolvable:$true] %s57_s23 }
  0x14   :  { %p5044_p9 = scmp.lt.u32.totalorder %s5040_s27, %s5752_s11 }
  0x16   :  { %p5046_p10 = pnand %p5044_p9, %p5041_p8 }
  0x18   :  { %5049 = shalt.err (!%p5046_p10)
}
  0x19   :  { %s5050_s15 = scalar_lea.vmem %s58_s23, 512  ;;  %p5055_p12 = scmp.lt.s32.totalorder %s58_s23, %s58_s23 }
  0x1a   :  { %p5051_p11 = scmp.ne.s32.totalorder %s58_s23, %s5050_s15  ;;  %p5056_p13 = scmp.lt.s32.totalorder %s5050_s15, %s5050_s15 }
  0x1c   :  { %p5057_p0 = por %p5056_p13, %p5055_p12 }
  0x1e   :  { %p5058_p1 = pnand %p5057_p0, %p5051_p11 }
  0x20   :  { %5061 = shalt.err (!%p5058_p1)
}
  0x21   :  { %63 = dma.hbm_to_vmem [thread:$0]  %s5752_s11, 512, %s58_s23, [#allocation5], %s5067_s18, %s5067_s18, %s5068_s19  }
  0x22   :  { %5062 = dma.done.wait [#allocation3], 512  }
  0x23   :  { %5063 = vsyncadd [#allocation3], 4294966784 }
  0x24   :  { %5064 = dma.done.wait [#allocation5], 512  }
  0x25   :  { %5065 = vsyncadd [#allocation5], 4294966784  ;;  %v5070_v0 = vmov 0   ;;  %v72_v1 = vld [vmem:[%s5741_s0] sm:$0xff]  ;;  %v89_v3 = vld [vmem:[#allocation2 + $0x8] sm:$0xff]  ;;  %v5071_v12 = vmov 0.0   ;;  %v76_v13 = vlaneseq }
  0x26   :  { %4935 = vset.pattern.permute.xlu0 %v5070_v0  ;;  %v88_v2 = vld [vmem:[#allocation2] sm:$0xff]  ;;  %v90_v4 = vld [vmem:[#allocation2 + $0x10] sm:$0xff]  ;;  %v91_v5 = vld [vmem:[#allocation2 + $0x18] sm:$0xff]  ;;  %vm92_vm0 = vcmask 261120   ;;  %vm5072_vm3 = vmmov 0   ;;  %s5073_s30 = smov 96  }
  0x27   :  { %79 = vperm.xlu0 %4935, %v72_v1   ;;  %v73_v6 = vld [vmem:[%s5741_s0 + $0x8] sm:$0xff]  ;;  %v4822_v7 = vpack.c.bf16 %v89_v3, %v88_v2  ;;  %v4826_v8 = vpack.c.bf16 %v91_v5, %v90_v4  ;;  %v178_v9 = vld [vmem:[%s5745_s4] sm:$0xff]  ;;  %v77_v14 = vand.u32 127, %v76_v13  ;;  %v180_v19 = vld [vmem:[%s5745_s4 + $0x10] sm:$0xff]  ;;  %vm289_vm4 = vcmask 64512   ;;  %s5074_s16 = smov 64  }
  0x28   :  { %v179_v10 = vld [vmem:[%s5745_s4 + $0x8] sm:$0xff]  ;;  %v181_v20 = vld [vmem:[%s5745_s4 + $0x18] sm:$0xff]  ;;  %v174_v22 = vld [vmem:[%s5744_s3] sm:$0xff]  ;;  %s5075_s17 = smov 120   ;;  %s5076_s20 = smov 88   ;;  %vm2056_vm5 = vcmask 523264  }
  0x29   :  { %4823 = vmatprep.subr.bf16.mxu0 %v4822_v7  ;;  %v4830_v11 = vpack.c.bf16 %v179_v10, %v178_v9  ;;  %v4834_v21 = vpack.c.bf16 %v181_v20, %v180_v19  ;;  %v4268_v27 = vld [vmem:[%s5746_s5] ss:$0 sm:$0xff]  ;;  %v5251_v38 = vld [vmem:[%s5742_s1 + $0x1] ss:$0 sm:$0xff]  ;;  %s5077_s21 = smov 56   ;;  %s5078_s11 = smov 80  }
  0x2a   :  { %4825 = vmatpush3.bf16.msra.mxu0 %v4822_v7  ;;  %v5245_v34 = vld [vmem:[%s5742_s1] ss:$0 sm:$0xff]  ;;  %s5079_s18 = smov 112   ;;  %s5080_s0 = smov 48   ;;  %vm4185_vm6 = vcmask 1041409  }
  0x2b   :  { %82 = vperm.xlu0 %4935, %v73_v6   ;;  %4827 = vmatprep.subr.bf16.mxu0 %v4826_v8  ;;  %v270_v49 = vld [vmem:[%s5747_s6] sm:$0xff]  ;;  %s5081_s23 = smov 72   ;;  %s5082_s24 = smov 104  }
  0x2c   :  { %4831 = vmatprep.subr.bf16.mxu1 %v4830_v11  ;;  %s5083_s29 = smov 40  }
  0x2d   :  { %4833 = vmatpush3.bf16.msra.mxu1 %v4830_v11 }
  0x2e   :  { %4829 = vmatpush3.bf16.msra.mxu0 %v4826_v8  ;;  %4835 = vmatprep.subr.bf16.mxu1 %v4834_v21 }
  0x2f   :  { %4550 = vmatprep.subr.mxu0 %v5071_v12 }
  0x31   :  { %4837 = vmatpush3.bf16.msra.mxu1 %v4834_v21 }
  0x32   :  { %4540 = vmatprep.subr.mxu1 %v5071_v12 }
  0xa6   :  { %v80_v15 = vpop.permute.xlu0 %79 }
  0xa7   :  { %vm84_vm1 = vcmp.eq.s32.totalorder %v80_v15, %v77_v14 }
  0xa8   :  { %v86_v16 = vsel %vm84_vm1, 1.0, %v5071_v12 }
  0xa9   :  { %4526 = vmatprep.mubr.msk.f32.mxu0 %vm92_vm0, %v86_v16 }
  0xaa   :  { %v83_v17 = vpop.permute.xlu0 %82 }
  0xab   :  { %vm85_vm2 = vcmp.eq.s32.totalorder %v83_v17, %v77_v14 }
  0xac   :  { %v87_v18 = vsel %vm85_vm2, 1.0, %v5071_v12 }
  0xad   :  { %4527 = vmatmul.mubr.msk.f32.vlgmr.msra.gmra.mrb[0].mxu0 %vm92_vm0, %v87_v18 }
  0xae   :  { %4552 = vmatprep.mubr.msk.f32.mxu0 %vm5072_vm3, %v5071_v12 }
 0x180   :  { %v4528_v23 = vpop.f32.mrb[0].mxu0 }
 0x181   :  { %v165_v24 = vpop.f32.mrb[1].mxu0  ;;  %v5209_v26 = vadd.f32 %v4528_v23, %v174_v22 }
 0x182   :  { %v5207_v25 = vadd.f32 %v174_v22, %v165_v24 }
 0x184   :  { %4537 = vmatprep.mubr.msk.f32.mxu1 %vm92_vm0, %v5207_v25 }
 0x185   :  { %4538 = vmatmul.mubr.msk.f32.vlgmr.msra.gmra.mrb[0].mxu1 %vm92_vm0, %v5209_v26 }
 0x186   :  { %4542 = vmatprep.mubr.msk.f32.mxu1 %vm5072_vm3, %v5071_v12 }
 0x258   :  { %v4539_v28 = vpop.f32.mrb[0].mxu1 }
 0x259   :  { %v261_v29 = vpop.f32.mrb[1].mxu1  ;;  %v5226_v31 = vadd.f32 %v4539_v28, %v4268_v27 }
 0x25a   :  { %v5222_v30 = vadd.f32 %v4268_v27, %v261_v29 }
 0x25c   :  { %287 = vrot.lane.b32.xlu1 %v5222_v30, %s5073_s30 }
 0x260   :  { %365 = vrot.lane.b32.xlu1 %v5226_v31, %s5073_s30 }
 0x2ce   :  { %v288_v32 = vpop.permute.xlu1 %287 }
 0x2cf   :  { %4541 = vmatpush3.xpose.msk.msra.mxu1 %vm289_vm4, %v288_v32 }
 0x2d0   :  { %4545 = vmatprep.subr.mxu1 %v5071_v12 }
 0x2d2   :  { %4543 = vmatmul.mubr.msk.f32.vlgmr.msra.gmra.mrb[2].mxu1 %vm289_vm4, %v5222_v30  ;;  %v366_v33 = vpop.permute.xlu1 %365 }
 0x2d3   :  { %4546 = vmatpush3.xpose.msk.msra.mxu1 %vm289_vm4, %v366_v33  ;;  %4547 = vmatprep.mubr.msk.f32.mxu1 %vm5072_vm3, %v5071_v12 }
 0x2d4   :  { %4555 = vmatprep.subr.mxu1 %v5071_v12 }
 0x2d6   :  { %4548 = vmatmul.mubr.msk.f32.vlgmr.msra.gmra.mrb[4].mxu1 %vm289_vm4, %v5226_v31 }
 0x2d7   :  { %4557 = vmatprep.mubr.msk.f32.mxu1 %vm5072_vm3, %v5071_v12 }
 0x3a5   :  { %v360_v35 = vpop.f32.mrb[2].mxu1 }
 0x3a6   :  { %v361_v36 = vadd.f32 %v5245_v34, %v360_v35  ;;  %v4544_v37 = vpop.f32.mrb[3].mxu1 }
 0x3a8   :  { %v441_v39 = vmul.f32 1.442695, %v361_v36 }
 0x3a9   :  { %v437_v40 = vpop.f32.mrb[4].mxu1 }
 0x3aa   :  { %4936 = vpow2.f32 %v441_v39  ;;  %v438_v41 = vadd.f32 %v5251_v38, %v437_v40  ;;  %v4549_v42 = vpop.f32.mrb[5].mxu1 }
 0x3ac   :  { %v443_v43 = vmul.f32 1.442695, %v438_v41 }
 0x3ae   :  { %4938 = vpow2.f32 %v443_v43 }
 0x3b4   :  { %v4937_v44 = vpop.eup %4936 }
 0x3b5   :  { %v445_v45 = vsel %vm289_vm4, %v4937_v44, 0.0 }
 0x3b6   :  { %446 = vadd.xlane.f32.xlu0 %v445_v45 }
 0x3b8   :  { %v4939_v46 = vpop.eup %4938 }
 0x3b9   :  { %v448_v47 = vsel %vm289_vm4, %v4939_v46, 0.0 }
 0x3ba   :  { %449 = vadd.xlane.f32.xlu1 %v448_v47  ;;  %v271_v47 = vld [vmem:[%s5747_s6 + $0x8] sm:$0xff] }
 0x3cb   :  { %531 = vrot.lane.b32.xlu1 %v5226_v31, %s5074_s16 }
 0x3cc   :  { %455 = vrot.lane.b32.xlu0 %v5222_v30, %s5074_s16 }
 0x3cf   :  { %694 = vrot.lane.b32.xlu1 %v5222_v30, %s5075_s17 }
 0x3d0   :  { %696 = vrot.lane.b32.xlu0 %v5222_v30, %s5076_s20 }
 0x3d3   :  { %772 = vrot.lane.b32.xlu1 %v5226_v31, %s5075_s17 }
 0x3d4   :  { %774 = vrot.lane.b32.xlu0 %v5226_v31, %s5076_s20 }
 0x3d7   :  { %864 = vrot.lane.b32.xlu1 %v5222_v30, %s5077_s21 }
 0x3db   :  { %1101 = vrot.lane.b32.xlu1 %v5222_v30, %s5078_s11 }
 0x3df   :  { %1099 = vrot.lane.b32.xlu1 %v5222_v30, %s5079_s18 }
 0x3e3   :  { %1179 = vrot.lane.b32.xlu1 %v5226_v31, %s5078_s11 }
 0x3e7   :  { %1177 = vrot.lane.b32.xlu1 %v5226_v31, %s5079_s18 }
 0x443   :  { %v447_v48 = vpop.xlane.xlu0 %446 }
 0x444   :  { %4940 = vrcp.f32 %v447_v48 }
 0x447   :  { %v456_v50 = vpop.permute.xlu0 %455  ;;  %v450_v51 = vpop.xlane.xlu1 %449 }
 0x448   :  { %4942 = vrcp.f32 %v450_v51  ;;  %4551 = vmatpush3.msra.mxu0 %v456_v50 }
 0x449   :  { %4560 = vmatprep.subr.mxu0 %v270_v49 }
 0x44b   :  { %v532_v52 = vpop.permute.xlu1 %531  ;;  %v697_v59 = vpop.permute.xlu0 %696 }
 0x44c   :  { %4556 = vmatpush3.msra.mxu1 %v532_v52 }
 0x44d   :  { %4565 = vmatprep.subr.mxu1 %v5071_v12 }
 0x44e   :  { %v4941_v53 = vpop.eup %4940 }
 0x44f   :  { %v453_v54 = vmul.f32 %v4941_v53, %v4937_v44  ;;  %v695_v55 = vpop.permute.xlu1 %694  ;;  %v775_v0 = vpop.permute.xlu0 %774 }
 0x451   :  { %4553 = vmatmul.mubr.msk.f32.vlgmr.msra.gmra.mrb[2].mxu0 %vm289_vm4, %v453_v54 }
 0x452   :  { %v4943_v56 = vpop.eup %4942  ;;  %4561 = vmatpush3.msra.mxu0 %v270_v49 }
 0x453   :  { %v454_v57 = vmul.f32 %v4943_v56, %v4939_v46  ;;  %v773_v58 = vpop.permute.xlu1 %772  ;;  %4570 = vmatprep.subr.mxu0 %v5071_v12 }
 0x455   :  { %4558 = vmatmul.mubr.msk.f32.vlgmr.msra.gmra.mrb[6].mxu1 %vm289_vm4, %v454_v57 }
 0x456   :  { %4566 = vmatpush3.xpose.msk.msra.mxu1 %vm289_vm4, %v697_v59  ;;  %4567 = vmatprep.mubr.msk.f32.mxu1 %vm5072_vm3, %v5071_v12 }
 0x457   :  { %v865_v60 = vpop.permute.xlu1 %864  ;;  %4575 = vmatprep.subr.mxu1 %v5071_v12 }
 0x459   :  { %4568 = vmatmul.mubr.msk.f32.vlgmr.msra.gmra.mrb[8].mxu1 %vm289_vm4, %v695_v55 }
 0x45a   :  { %4576 = vmatpush3.msra.mxu1 %v865_v60  ;;  %4577 = vmatprep.mubr.msk.f32.mxu1 %vm5072_vm3, %v5071_v12  ;;  %v272_v60 = vld [vmem:[%s5747_s6 + $0x10] sm:$0xff] }
 0x45b   :  { %4590 = vmatprep.subr.mxu1 %v5071_v12  ;;  %v1102_v9 = vpop.permute.xlu1 %1101 }
 0x45f   :  { %v1100_v11 = vpop.permute.xlu1 %1099 }
 0x463   :  { %v1180_v16 = vpop.permute.xlu1 %1179 }
 0x467   :  { %v1178_v17 = vpop.permute.xlu1 %1177 }
 0x524   :  { %v527_v61 = vpop.f32.mrb[2].mxu0 }
 0x525   :  { %v4554_v62 = vpop.f32.mrb[3].mxu0  ;;  %4562 = vmatprep.mubr.msk.f32.mxu0 %vm289_vm4, %v527_v61 }
 0x528   :  { %v603_v63 = vpop.f32.mrb[6].mxu1 }
 0x529   :  { %v4559_v1 = vpop.f32.mrb[7].mxu1  ;;  %4563 = vmatmul.mubr.msk.f32.vlgmr.msra.gmra.mrb[4].mxu0 %vm289_vm4, %v603_v63 }
 0x52a   :  { %4571 = vmatpush3.xpose.msk.msra.mxu0 %vm289_vm4, %v775_v0  ;;  %4572 = vmatprep.mubr.msk.f32.mxu0 %vm5072_vm3, %v5071_v12 }
 0x52b   :  { %4580 = vmatprep.subr.mxu0 %v5071_v12 }
 0x52c   :  { %v768_v2 = vpop.f32.mrb[8].mxu1 }
 0x52d   :  { %v769_v3 = vadd.f32 %v5245_v34, %v768_v2  ;;  %v4569_v4 = vpop.f32.mrb[9].mxu1  ;;  %4573 = vmatmul.mubr.msk.f32.vlgmr.msra.gmra.mrb[6].mxu0 %vm289_vm4, %v773_v58 }
 0x52e   :  { %4582 = vmatprep.mubr.msk.f32.mxu0 %vm5072_vm3, %v5071_v12 }
 0x52f   :  { %v850_v5 = vmul.f32 1.442695, %v769_v3 }
 0x531   :  { %4944 = vpow2.f32 %v850_v5 }
 0x53b   :  { %v4945_v6 = vpop.eup %4944 }
 0x53c   :  { %v854_v7 = vsel %vm289_vm4, %v4945_v6, 0.0 }
 0x53d   :  { %855 = vadd.xlane.f32.xlu0 %v854_v7 }
 0x553   :  { %940 = vrot.lane.b32.xlu0 %v5226_v31, %s5077_s21 }
 0x5ca   :  { %v856_v8 = vpop.xlane.xlu0 %855 }
 0x5cb   :  { %4946 = vrcp.f32 %v856_v8 }
 0x5ce   :  { %v941_v10 = vpop.permute.xlu0 %940 }
 0x5cf   :  { %4581 = vmatpush3.msra.mxu0 %v941_v10 }
 0x5d0   :  { %4585 = vmatprep.subr.mxu0 %v271_v47 }
 0x5d5   :  { %v4947_v14 = vpop.eup %4946 }
 0x5d6   :  { %v862_v15 = vmul.f32 %v4947_v14, %v4945_v6 }
 0x5d8   :  { %4578 = vmatmul.mubr.msk.f32.vlgmr.msra.gmra.mrb[10].mxu1 %vm289_vm4, %v862_v15 }
 0x5d9   :  { %4591 = vmatpush3.xpose.msk.msra.mxu1 %vm289_vm4, %v1102_v9  ;;  %4592 = vmatprep.mubr.msk.f32.mxu1 %vm5072_vm3, %v5071_v12 }
 0x5da   :  { %4595 = vmatprep.subr.mxu1 %v5071_v12 }
 0x5dc   :  { %4593 = vmatmul.mubr.msk.f32.vlgmr.msra.gmra.mrb[12].mxu1 %vm289_vm4, %v1100_v11 }
 0x5dd   :  { %4596 = vmatpush3.xpose.msk.msra.mxu1 %vm289_vm4, %v1180_v16  ;;  %4597 = vmatprep.mubr.msk.f32.mxu1 %vm5072_vm3, %v5071_v12 }
 0x5de   :  { %4605 = vmatprep.subr.mxu1 %v5071_v12 }
 0x5e0   :  { %4598 = vmatmul.mubr.msk.f32.vlgmr.msra.gmra.mrb[14].mxu1 %vm289_vm4, %v1178_v17 }
 0x5e1   :  { %4607 = vmatprep.mubr.msk.f32.mxu1 %vm5072_vm3, %v5071_v12 }
 0x600   :  { %v846_v18 = vpop.f32.mrb[6].mxu0 }
 0x601   :  { %v847_v19 = vadd.f32 %v5251_v38, %v846_v18  ;;  %v4574_v20 = vpop.f32.mrb[7].mxu0 }
 0x603   :  { %v852_v21 = vmul.f32 1.442695, %v847_v19 }
 0x605   :  { %4948 = vpow2.f32 %v852_v21 }
 0x60f   :  { %v4949_v22 = vpop.eup %4948 }
 0x610   :  { %v857_v23 = vsel %vm289_vm4, %v4949_v22, 0.0 }
 0x611   :  { %858 = vadd.xlane.f32.xlu1 %v857_v23  ;;  %v273_v23 = vld [vmem:[%s5747_s6 + $0x18] sm:$0xff] }
 0x622   :  { %1269 = vrot.lane.b32.xlu1 %v5222_v30, %s5080_s0 }
 0x69e   :  { %v859_v24 = vpop.xlane.xlu1 %858 }
 0x69f   :  { %4950 = vrcp.f32 %v859_v24 }
 0x6a2   :  { %v1270_v48 = vpop.permute.xlu1 %1269 }
 0x6a9   :  { %v4951_v27 = vpop.eup %4950 }
 0x6aa   :  { %v863_v28 = vmul.f32 %v4951_v27, %v4949_v22 }
 0x6ab   :  { %v936_v29 = vpop.f32.mrb[10].mxu1 }
 0x6ac   :  { %v4579_v32 = vpop.f32.mrb[11].mxu1  ;;  %4583 = vmatmul.mubr.msk.f32.vlgmr.msra.gmra.mrb[8].mxu0 %vm289_vm4, %v863_v28 }
 0x6ad   :  { %4587 = vmatprep.mubr.msk.f32.mxu0 %vm289_vm4, %v936_v29  ;;  %4586 = vmatpush3.msra.mxu0 %v271_v47  ;;  %v5385_v32 = vshrl.u32 %v76_v13, 7 }
 0x6ae   :  { %4600 = vmatprep.subr.mxu0 %v5071_v12 }
 0x6af   :  { %v1173_v33 = vpop.f32.mrb[12].mxu1 }
 0x6b0   :  { %v1174_v35 = vadd.f32 %v5245_v34, %v1173_v33  ;;  %v4594_v36 = vpop.f32.mrb[13].mxu1  ;;  %v690_v33 = vsub.s32 0, %v5385_v32 }
 0x6b2   :  { %v1255_v37 = vmul.f32 1.442695, %v1174_v35  ;;  %v5391_v35 = vld [vmem:[%s5751_s10] sm:$0x3f] }
 0x6b3   :  { %v1251_v39 = vpop.f32.mrb[14].mxu1  ;;  %v691_v36 = vrot.slane %v5391_v35, %v690_v33 }
 0x6b4   :  { %4952 = vpow2.f32 %v1255_v37  ;;  %v1252_v40 = vadd.f32 %v5251_v38, %v1251_v39  ;;  %v4599_v41 = vpop.f32.mrb[15].mxu1 }
 0x6b6   :  { %v1257_v42 = vmul.f32 1.442695, %v1252_v40 }
 0x6b8   :  { %4954 = vpow2.f32 %v1257_v42 }
 0x6be   :  { %v4953_v43 = vpop.eup %4952 }
 0x6bf   :  { %v1259_v44 = vsel %vm289_vm4, %v4953_v43, 0.0 }
 0x6c0   :  { %1260 = vadd.xlane.f32.xlu0 %v1259_v44 }
 0x6c2   :  { %v4955_v45 = vpop.eup %4954 }
 0x6c3   :  { %v1262_v46 = vsel %vm289_vm4, %v4955_v45, 0.0 }
 0x6c4   :  { %1263 = vadd.xlane.f32.xlu1 %v1262_v46 }
 0x6d5   :  { %1345 = vrot.lane.b32.xlu1 %v5226_v31, %s5080_s0 }
 0x6d6   :  { %1584 = vrot.lane.b32.xlu0 %v5226_v31, %s5081_s23 }
 0x6d9   :  { %1506 = vrot.lane.b32.xlu1 %v5222_v30, %s5081_s23 }
 0x6dd   :  { %1504 = vrot.lane.b32.xlu1 %v5222_v30, %s5082_s24 }
 0x6e1   :  { %1582 = vrot.lane.b32.xlu1 %v5226_v31, %s5082_s24 }
 0x74d   :  { %v1261_v55 = vpop.xlane.xlu0 %1260 }
 0x751   :  { %v1264_v49 = vpop.xlane.xlu1 %1263  ;;  %v1585_v7 = vpop.permute.xlu0 %1584 }
 0x752   :  { %4956 = vrcp.f32 %v1264_v49 }
 0x753   :  { %4958 = vrcp.f32 %v1261_v55 }
 0x755   :  { %v1346_v50 = vpop.permute.xlu1 %1345 }
 0x756   :  { %4606 = vmatpush3.msra.mxu1 %v1346_v50 }
 0x757   :  { %4615 = vmatprep.subr.mxu1 %v5071_v12 }
 0x759   :  { %v1507_v52 = vpop.permute.xlu1 %1506 }
 0x75c   :  { %v4957_v51 = vpop.eup %4956 }
 0x75d   :  { %v1268_v53 = vmul.f32 %v4957_v51, %v4955_v45  ;;  %v1505_v54 = vpop.permute.xlu1 %1504  ;;  %v4959_v56 = vpop.eup %4958 }
 0x75e   :  { %v1267_v59 = vmul.f32 %v4959_v56, %v4953_v43  ;;  %v1952_v56 = vld [vmem:[%s5748_s7 + $0x10] sm:$0xff] }
 0x75f   :  { %4608 = vmatmul.mubr.msk.f32.vlgmr.msra.gmra.mrb[16].mxu1 %vm289_vm4, %v1268_v53 }
 0x760   :  { %4616 = vmatpush3.xpose.msk.msra.mxu1 %vm289_vm4, %v1507_v52  ;;  %4617 = vmatprep.mubr.msk.f32.mxu1 %vm5072_vm3, %v5071_v12 }
 0x761   :  { %4625 = vmatprep.subr.mxu1 %v5071_v12  ;;  %v1583_v8 = vpop.permute.xlu1 %1582 }
 0x763   :  { %4618 = vmatmul.mubr.msk.f32.vlgmr.msra.gmra.mrb[18].mxu1 %vm289_vm4, %v1505_v54  ;;  %v1951_v54 = vld [vmem:[%s5748_s7 + $0x8] sm:$0xff] }
 0x764   :  { %4627 = vmatprep.mubr.msk.f32.mxu1 %vm5072_vm3, %v5071_v12 }
 0x77f   :  { %v1012_v57 = vpop.f32.mrb[8].mxu0 }
 0x780   :  { %v4584_v58 = vpop.f32.mrb[9].mxu0  ;;  %4588 = vmatmul.mubr.msk.f32.vlgmr.msra.gmra.mrb[4].mxu0 %vm289_vm4, %v1012_v57  ;;  %v1953_v57 = vld [vmem:[%s5748_s7 + $0x18] sm:$0xff] }
 0x781   :  { %4601 = vmatpush3.msra.mxu0 %v1270_v48  ;;  %4602 = vmatprep.mubr.msk.f32.mxu0 %vm5072_vm3, %v5071_v12  ;;  %v4842_v58 = vpack.c.bf16 %v1953_v57, %v1952_v56 }
 0x782   :  { %4610 = vmatprep.subr.mxu0 %v272_v60 }
 0x784   :  { %4603 = vmatmul.mubr.msk.f32.vlgmr.msra.gmra.mrb[10].mxu0 %vm289_vm4, %v1267_v59  ;;  %v2044_v59 = vld [vmem:[%s5750_s9] sm:$0xff] }
 0x785   :  { %4611 = vmatpush3.msra.mxu0 %v272_v60  ;;  %v2045_v60 = vld [vmem:[%s5750_s9 + $0x8] sm:$0xff] }
 0x786   :  { %4620 = vmatprep.subr.mxu0 %v5071_v12 }
 0x832   :  { %v1417_v61 = vpop.f32.mrb[16].mxu1 }
 0x833   :  { %v4609_v62 = vpop.f32.mrb[17].mxu1 }
 0x834   :  { %v4846_v62 = vpack.c.bf16 %v2045_v60, %v2044_v59  ;;  %v4312_v59 = vld [vmem:[%s5745_s4 + $0x28] sm:$0xff] }
 0x836   :  { %v1578_v63 = vpop.f32.mrb[18].mxu1 }
 0x837   :  { %v1579_v0 = vadd.f32 %v5245_v34, %v1578_v63  ;;  %v4619_v1 = vpop.f32.mrb[19].mxu1  ;;  %v2047_v63 = vld [vmem:[%s5750_s9 + $0x18] sm:$0xff] }
 0x838   :  { %v2048_v1 = vld [vmem:[%s5750_s9 + $0x20] sm:$0xff] }
 0x839   :  { %v1660_v2 = vmul.f32 1.442695, %v1579_v0 }
 0x83b   :  { %4960 = vpow2.f32 %v1660_v2  ;;  %v2049_v2 = vld [vmem:[%s5750_s9 + $0x28] sm:$0xff] }
 0x845   :  { %v4961_v3 = vpop.eup %4960 }
 0x846   :  { %v1664_v4 = vsel %vm289_vm4, %v4961_v3, 0.0 }
 0x847   :  { %1665 = vadd.xlane.f32.xlu1 %v1664_v4 }
 0x857   :  { %v1341_v5 = vpop.f32.mrb[10].mxu0 }
 0x858   :  { %v4604_v6 = vpop.f32.mrb[11].mxu0  ;;  %4612 = vmatprep.mubr.msk.f32.mxu0 %vm289_vm4, %v1341_v5  ;;  %1674 = vrot.lane.b32.xlu1 %v5222_v30, %s5083_s29 }
 0x859   :  { %4613 = vmatmul.mubr.msk.f32.vlgmr.msra.gmra.mrb[4].mxu0 %vm289_vm4, %v1417_v61  ;;  %v2046_v61 = vld [vmem:[%s5750_s9 + $0x10] sm:$0xff] }
 0x85a   :  { %4621 = vmatpush3.xpose.msk.msra.mxu0 %vm289_vm4, %v1585_v7  ;;  %4622 = vmatprep.mubr.msk.f32.mxu0 %vm5072_vm3, %v5071_v12  ;;  %v4850_v0 = vpack.c.bf16 %v2047_v63, %v2046_v61  ;;  %v4313_v61 = vld [vmem:[%s5745_s4 + $0x30] sm:$0xff] }
 0x85b   :  { %4630 = vmatprep.subr.mxu0 %v5071_v12 }
 0x85d   :  { %4623 = vmatmul.mubr.msk.f32.vlgmr.msra.gmra.mrb[12].mxu0 %vm289_vm4, %v1583_v8 }
 0x85e   :  { %4632 = vmatprep.mubr.msk.f32.mxu0 %vm5072_vm3, %v5071_v12 }
 0x8d4   :  { %v1666_v9 = vpop.xlane.xlu1 %1665 }
 0x8d5   :  { %4962 = vrcp.f32 %v1666_v9 }
 0x8d8   :  { %v1675_v10 = vpop.permute.xlu1 %1674 }
 0x8d9   :  { %4626 = vmatpush3.msra.mxu1 %v1675_v10  ;;  %v1940_v10 = vsub.s32 1, %v5385_v32 }
 0x8df   :  { %v4963_v30 = vpop.eup %4962 }
 0x8e0   :  { %v1672_v11 = vmul.f32 %v4963_v30, %v4961_v3  ;;  %v4854_v3 = vpack.c.bf16 %v2049_v2, %v2048_v1  ;;  %v1946_v30 = vsub.s32 2, %v5385_v32 }
 0x8e2   :  { %4628 = vmatmul.mubr.msk.f32.vlgmr.msra.gmra.mrb[20].mxu1 %vm289_vm4, %v1672_v11  ;;  %v1941_v11 = vrot.slane %v5391_v35, %v1940_v10 }
 0x930   :  { %v1656_v14 = vpop.f32.mrb[12].mxu0 }
 0x931   :  { %v1657_v15 = vadd.f32 %v5251_v38, %v1656_v14  ;;  %v4624_v16 = vpop.f32.mrb[13].mxu0 }
 0x932   :  { %v1947_v16 = vrot.slane %v5391_v35, %v1946_v30 }
 0x933   :  { %v1662_v17 = vmul.f32 1.442695, %v1657_v15 }
 0x935   :  { %4964 = vpow2.f32 %v1662_v17 }
 0x93f   :  { %v4965_v18 = vpop.eup %4964 }
 0x940   :  { %v1667_v19 = vsel %vm289_vm4, %v4965_v18, 0.0 }
 0x941   :  { %1668 = vadd.xlane.f32.xlu0 %v1667_v19 }
 0x957   :  { %1750 = vrot.lane.b32.xlu0 %v5226_v31, %s5083_s29 }
 0x9b5   :  { %v1746_v20 = vpop.f32.mrb[20].mxu1 }
 0x9b6   :  { %v4629_v21 = vpop.f32.mrb[21].mxu1 }
 0x9ce   :  { %v1669_v22 = vpop.xlane.xlu0 %1668 }
 0x9cf   :  { %4966 = vrcp.f32 %v1669_v22 }
 0x9d2   :  { %v1751_v24 = vpop.permute.xlu0 %1750 }
 0x9d3   :  { %4631 = vmatpush3.msra.mxu0 %v1751_v24  ;;  %v2051_v24 = vld [vmem:[%s5750_s9 + $0x38] sm:$0xff] }
 0x9d4   :  { %4635 = vmatprep.subr.mxu0 %v273_v23 }
 0x9d9   :  { %v4967_v27 = vpop.eup %4966 }
 0x9da   :  { %v1673_v28 = vmul.f32 %v4967_v27, %v4965_v18 }
 0x9dc   :  { %4633 = vmatmul.mubr.msk.f32.vlgmr.msra.gmra.mrb[14].mxu0 %vm289_vm4, %v1673_v28  ;;  %v4305_v28 = vld [vmem:[%s5749_s8] ss:$0 sm:$0xff] }
 0x9dd   :  { %4637 = vmatprep.mubr.msk.f32.mxu0 %vm289_vm4, %v1746_v20  ;;  %4636 = vmatpush3.msra.mxu0 %v273_v23  ;;  %v2050_v23 = vld [vmem:[%s5750_s9 + $0x30] sm:$0xff] }
 0x9de   :  { %4847 = vmatprep.subr.bf16.mxu0 %v4846_v62  ;;  %v4858_v27 = vpack.c.bf16 %v2051_v24, %v2050_v23 }
 0xaaf   :  { %v1822_v29 = vpop.f32.mrb[14].mxu0 }
 0xab0   :  { %v4634_v31 = vpop.f32.mrb[15].mxu0  ;;  %4638 = vmatmul.mubr.msk.f32.vlgmr.msra.gmra.mrb[4].mxu0 %vm289_vm4, %v1822_v29 }
 0xab1   :  { %4849 = vmatpush3.bf16.msra.mxu0 %v4846_v62  ;;  %v4314_v62 = vld [vmem:[%s5745_s4 + $0x38] sm:$0xff] }
 0xab2   :  { %4851 = vmatprep.subr.bf16.mxu0 %v4850_v0  ;;  %v4866_v63 = vpack.c.bf16 %v4314_v62, %v4313_v61 }
 0xab5   :  { %4853 = vmatpush3.bf16.msra.mxu0 %v4850_v0 }
 0xab6   :  { %4855 = vmatprep.subr.bf16.mxu0 %v4854_v3 }
 0xab9   :  { %4857 = vmatpush3.bf16.msra.mxu0 %v4854_v3 }
 0xaba   :  { %4859 = vmatprep.subr.bf16.mxu0 %v4858_v27 }
 0xabd   :  { %4861 = vmatpush3.bf16.msra.mxu0 %v4858_v27 }
 0xabe   :  { %4691 = vmatprep.subr.mxu0 %v5071_v12 }
 0xb83   :  { %v4639_v37 = vpop.f32.mrb[4].mxu0 }
 0xb84   :  { %v4900_v39 = vadd.f32 %v4639_v37, %v691_v36  ;;  %v1898_v40 = vpop.f32.mrb[5].mxu0 }
 0xb85   :  { %v4901_v41 = vadd.f32 %v1898_v40, %v691_v36 }
 0xb86   :  { %v1910_v42 = vadd.f32 %v4900_v39, %v5209_v26 }
 0xb87   :  { %v1909_v13 = vadd.f32 %v4901_v41, %v5207_v25  ;;  %v1950_v25 = vld [vmem:[%s5748_s7] sm:$0xff]  ;;  %v2054_v41 = vsub.s32 3, %v5385_v32 }
 0xb88   :  { %v1914_v43 = vsel %vm92_vm0, %v1910_v42, 0.0  ;;  %v4838_v55 = vpack.c.bf16 %v1951_v54, %v1950_v25 }
 0xb89   :  { %1915 = vadd.xlane.f32.xlu0 %v1914_v43  ;;  %v1911_v44 = vsel %vm92_vm0, %v1909_v13, 0.0 }
 0xb8a   :  { %1912 = vadd.xlane.f32.xlu1 %v1911_v44  ;;  %4839 = vmatprep.subr.bf16.mxu1 %v4838_v55 }
 0xb8b   :  { %4841 = vmatpush3.bf16.msra.mxu1 %v4838_v55 }
 0xb8c   :  { %4843 = vmatprep.subr.bf16.mxu1 %v4842_v58 }
 0xb8f   :  { %4845 = vmatpush3.bf16.msra.mxu1 %v4842_v58  ;;  %v4311_v58 = vld [vmem:[%s5745_s4 + $0x20] sm:$0xff] }
 0xb90   :  { %v4862_v60 = vpack.c.bf16 %v4312_v59, %v4311_v58 }
 0xb92   :  { %4863 = vmatprep.subr.bf16.mxu1 %v4862_v60 }
 0xc16   :  { %v1916_v45 = vpop.xlane.xlu0 %1915 }
 0xc17   :  { %v1919_v46 = vmul.f32 0.03125, %v1916_v45  ;;  %v1913_v47 = vpop.xlane.xlu1 %1912 }
 0xc18   :  { %v1918_v48 = vmul.f32 0.03125, %v1913_v47 }
 0xc19   :  { %v1921_v49 = vsub.f32 %v1910_v42, %v1919_v46  ;;  %v2055_v42 = vrot.slane %v5391_v35, %v2054_v41 }
 0xc1a   :  { %v1920_v50 = vsub.f32 %v1909_v13, %v1918_v48 }
 0xc1b   :  { %v1923_v53 = vmul.f32 %v1921_v49, %v1921_v49 }
 0xc1c   :  { %v1922_v51 = vmul.f32 %v1920_v50, %v1920_v50 }
 0xc1d   :  { %v1927_v26 = vsel %vm92_vm0, %v1923_v53, 0.0 }
 0xc1e   :  { %v1924_v52 = vsel %vm92_vm0, %v1922_v51, 0.0 }
 0xc1f   :  { %1925 = vadd.xlane.f32.xlu1 %v1924_v52 }
 0xc23   :  { %1928 = vadd.xlane.f32.xlu1 %v1927_v26 }
 0xcac   :  { %v1926_v4 = vpop.xlane.xlu1 %1925 }
 0xcad   :  { %v1930_v5 = vmul.f32 0.03125, %v1926_v4 }
 0xcaf   :  { %v1932_v6 = vadd.f32 1e-05, %v1930_v5 }
 0xcb0   :  { %v1929_v7 = vpop.xlane.xlu1 %1928 }
 0xcb1   :  { %4968 = vrsqrt.f32 %v1932_v6  ;;  %v1931_v8 = vmul.f32 0.03125, %v1929_v7  ;;  %v2168_v6 = vsub.s32 4, %v5385_v32  ;;  %v2174_v7 = vsub.s32 5, %v5385_v32 }
 0xcb3   :  { %v1933_v9 = vadd.f32 1e-05, %v1931_v8  ;;  %v2169_v8 = vrot.slane %v5391_v35, %v2168_v6 }
 0xcb5   :  { %4970 = vrsqrt.f32 %v1933_v9 }
 0xcbb   :  { %v4969_v14 = vpop.eup %4968 }
 0xcbc   :  { %v1936_v15 = vmul.f32 %v4969_v14, %v1920_v50 }
 0xcbe   :  { %v1942_v17 = vmul.f32 %v1941_v11, %v1936_v15 }
 0xcbf   :  { %v4971_v18 = vpop.eup %4970 }
 0xcc0   :  { %v1937_v19 = vmul.f32 %v4971_v18, %v1921_v49  ;;  %v1948_v20 = vadd.f32 %v1947_v16, %v1942_v17 }
 0xcc2   :  { %v1943_v21 = vmul.f32 %v1941_v11, %v1937_v19  ;;  %4648 = vmatprep.mubr.msk.f32.mxu1 %vm92_vm0, %v1948_v20 }
 0xcc4   :  { %v1949_v22 = vadd.f32 %v1947_v16, %v1943_v21  ;;  %v2175_v16 = vrot.slane %v5391_v35, %v2174_v7  ;;  %v4316_v21 = vld [vmem:[%s5746_s5 + $0x1] ss:$0 sm:$0xff] }
 0xcc6   :  { %4649 = vmatmul.mubr.msk.f32.vlgmr.msra.gmra.mrb[22].mxu1 %vm92_vm0, %v1949_v22 }
 0xcc7   :  { %4865 = vmatpush3.bf16.msra.mxu1 %v4862_v60 }
 0xcc8   :  { %4867 = vmatprep.subr.bf16.mxu1 %v4866_v63 }
 0xccb   :  { %4869 = vmatpush3.bf16.msra.mxu1 %v4866_v63 }
 0xccc   :  { %4681 = vmatprep.subr.mxu1 %v5071_v12 }
 0xd99   :  { %v4650_v29 = vpop.f32.mrb[22].mxu1 }
 0xd9a   :  { %v2039_v31 = vadd.f32 %v4650_v29, %v4305_v28  ;;  %v2033_v36 = vpop.f32.mrb[23].mxu1 }
 0xd9b   :  { %v2034_v37 = vadd.f32 %v4305_v28, %v2033_v36 }
 0xd9c   :  { %v2043_v40 = vmax.f32 %v2039_v31, 0.0 }
 0xd9d   :  { %v2042_v39 = vmax.f32 %v2034_v37, 0.0 }
 0xd9f   :  { %4667 = vmatprep.mubr.msk.f32.mxu0 %vm2056_vm5, %v2042_v39 }
 0xda0   :  { %4668 = vmatmul.mubr.msk.f32.vlgmr.msra.gmra.mrb[16].mxu0 %vm2056_vm5, %v2043_v40 }
 0xda1   :  { %4693 = vmatprep.mubr.msk.f32.mxu0 %vm5072_vm3, %v5071_v12 }
 0xe73   :  { %v4669_v13 = vpop.f32.mrb[16].mxu0 }
 0xe74   :  { %v2135_v43 = vadd.f32 %v4669_v13, %v2055_v42  ;;  %v2129_v44 = vpop.f32.mrb[17].mxu0 }
 0xe75   :  { %v2130_v45 = vadd.f32 %v2129_v44, %v2055_v42 }
 0xe76   :  { %v2139_v46 = vadd.f32 %v2135_v43, %v1949_v22 }
 0xe77   :  { %v2138_v47 = vadd.f32 %v2130_v45, %v1948_v20 }
 0xe78   :  { %v2143_v48 = vsel %vm92_vm0, %v2139_v46, 0.0 }
 0xe79   :  { %2144 = vadd.xlane.f32.xlu1 %v2143_v48  ;;  %v2140_v49 = vsel %vm92_vm0, %v2138_v47, 0.0 }
 0xe7a   :  { %2141 = vadd.xlane.f32.xlu0 %v2140_v49 }
 0xf06   :  { %v2145_v50 = vpop.xlane.xlu1 %2144 }
 0xf07   :  { %v2147_v51 = vmul.f32 0.03125, %v2145_v50  ;;  %v2142_v52 = vpop.xlane.xlu0 %2141  ;;  %v4319_v50 = vld [vmem:[%s5747_s6 + $0x20] sm:$0xff] }
 0xf08   :  { %v2146_v53 = vmul.f32 0.03125, %v2142_v52 }
 0xf09   :  { %v2149_v26 = vsub.f32 %v2139_v46, %v2147_v51 }
 0xf0a   :  { %v2148_v25 = vsub.f32 %v2138_v47, %v2146_v53 }
 0xf0b   :  { %v2151_v54 = vmul.f32 %v2149_v26, %v2149_v26 }
 0xf0c   :  { %v2150_v55 = vmul.f32 %v2148_v25, %v2148_v25 }
 0xf0d   :  { %v2155_v56 = vsel %vm92_vm0, %v2151_v54, 0.0 }
 0xf0e   :  { %2156 = vadd.xlane.f32.xlu1 %v2155_v56  ;;  %v2152_v57 = vsel %vm92_vm0, %v2150_v55, 0.0 }
 0xf0f   :  { %2153 = vadd.xlane.f32.xlu0 %v2152_v57 }
 0xf9b   :  { %v2157_v0 = vpop.xlane.xlu1 %2156 }
 0xf9c   :  { %v2159_v1 = vmul.f32 0.03125, %v2157_v0  ;;  %v2154_v2 = vpop.xlane.xlu0 %2153 }
 0xf9d   :  { %v2158_v3 = vmul.f32 0.03125, %v2154_v2 }
 0xf9e   :  { %v2161_v4 = vadd.f32 1e-05, %v2159_v1 }
 0xf9f   :  { %v2160_v5 = vadd.f32 1e-05, %v2158_v3 }
 0xfa0   :  { %4972 = vrsqrt.f32 %v2161_v4 }
 0xfa1   :  { %4974 = vrsqrt.f32 %v2160_v5 }
 0xfaa   :  { %v4973_v9 = vpop.eup %4972 }
 0xfab   :  { %v4975_v11 = vpop.eup %4974  ;;  %v2165_v14 = vmul.f32 %v4973_v9, %v2149_v26 }
 0xfac   :  { %v2164_v15 = vmul.f32 %v4975_v11, %v2148_v25 }
 0xfad   :  { %v2171_v17 = vmul.f32 %v2169_v8, %v2165_v14 }
 0xfae   :  { %v2170_v18 = vmul.f32 %v2169_v8, %v2164_v15 }
 0xfaf   :  { %v5487_v20 = vadd.f32 %v2175_v16, %v2171_v17 }
 0xfb0   :  { %v5485_v19 = vadd.f32 %v2175_v16, %v2170_v18 }
 0xfb2   :  { %4678 = vmatprep.mubr.msk.f32.mxu1 %vm92_vm0, %v5485_v19 }
 0xfb3   :  { %4679 = vmatmul.mubr.msk.f32.vlgmr.msra.gmra.mrb[24].mxu1 %vm92_vm0, %v5487_v20 }
 0xfb4   :  { %4683 = vmatprep.mubr.msk.f32.mxu1 %vm5072_vm3, %v5071_v12 }
0x1086   :  { %v4680_v35 = vpop.f32.mrb[24].mxu1 }
0x1087   :  { %v5498_v22 = vadd.f32 %v4680_v35, %v4316_v21  ;;  %v2265_v23 = vpop.f32.mrb[25].mxu1 }
0x1088   :  { %v5500_v24 = vadd.f32 %v4316_v21, %v2265_v23 }
0x1089   :  { %2357 = vrot.lane.b32.xlu1 %v5498_v22, %s5073_s30 }
0x108a   :  { %2280 = vrot.lane.b32.xlu0 %v5500_v24, %s5073_s30 }
0x10fb   :  { %v2358_v28 = vpop.permute.xlu1 %2357 }
0x10fc   :  { %v2281_v27 = vpop.permute.xlu0 %2280 }
0x10fd   :  { %4682 = vmatpush3.xpose.msk.msra.mxu1 %vm289_vm4, %v2281_v27 }
0x10fe   :  { %4686 = vmatprep.subr.mxu1 %v5071_v12 }
0x1100   :  { %4684 = vmatmul.mubr.msk.f32.vlgmr.msra.gmra.mrb[26].mxu1 %vm289_vm4, %v5500_v24 }
0x1101   :  { %4687 = vmatpush3.xpose.msk.msra.mxu1 %vm289_vm4, %v2358_v28  ;;  %4688 = vmatprep.mubr.msk.f32.mxu1 %vm5072_vm3, %v5071_v12 }
0x1102   :  { %4696 = vmatprep.subr.mxu1 %v5071_v12 }
0x1104   :  { %4689 = vmatmul.mubr.msk.f32.vlgmr.msra.gmra.mrb[28].mxu1 %vm289_vm4, %v5498_v22 }
0x1105   :  { %4698 = vmatprep.mubr.msk.f32.mxu1 %vm5072_vm3, %v5071_v12 }
0x11d3   :  { %v2352_v29 = vpop.f32.mrb[26].mxu1 }
0x11d4   :  { %v2353_v31 = vadd.f32 %v5245_v34, %v2352_v29  ;;  %v4685_v36 = vpop.f32.mrb[27].mxu1 }
0x11d6   :  { %v2433_v37 = vmul.f32 1.442695, %v2353_v31 }
0x11d7   :  { %v2429_v39 = vpop.f32.mrb[28].mxu1 }
0x11d8   :  { %4976 = vpow2.f32 %v2433_v37  ;;  %v2430_v40 = vadd.f32 %v5251_v38, %v2429_v39  ;;  %v4690_v42 = vpop.f32.mrb[29].mxu1  ;;  %v5016_v39 = vld [vmem:[%s5742_s1] ss:$0 sm:$0xff] }
0x11da   :  { %v2435_v13 = vmul.f32 1.442695, %v2430_v40 }
0x11dc   :  { %4978 = vpow2.f32 %v2435_v13 }
0x11e2   :  { %v4977_v43 = vpop.eup %4976 }
0x11e3   :  { %v2437_v44 = vsel %vm289_vm4, %v4977_v43, 0.0 }
0x11e4   :  { %2438 = vadd.xlane.f32.xlu1 %v2437_v44  ;;  %v5597_v44 = vld [vmem:[%s5742_s1 + $0x1] ss:$0 sm:$0xff] }
0x11e6   :  { %v4979_v45 = vpop.eup %4978 }
0x11e7   :  { %v2440_v46 = vsel %vm289_vm4, %v4979_v45, 0.0 }
0x11e8   :  { %2441 = vadd.xlane.f32.xlu0 %v2440_v46 }
0x11f5   :  { %2523 = vrot.lane.b32.xlu1 %v5498_v22, %s5074_s16 }
0x11f9   :  { %2688 = vrot.lane.b32.xlu1 %v5500_v24, %s5076_s20 }
0x11fd   :  { %2686 = vrot.lane.b32.xlu1 %v5500_v24, %s5075_s17 }
0x11fe   :  { %2447 = vrot.lane.b32.xlu0 %v5500_v24, %s5074_s16 }
0x1201   :  { %2764 = vrot.lane.b32.xlu1 %v5498_v22, %s5075_s17 }
0x1202   :  { %2766 = vrot.lane.b32.xlu0 %v5498_v22, %s5076_s20 }
0x1205   :  { %2856 = vrot.lane.b32.xlu1 %v5500_v24, %s5077_s21 }
0x1209   :  { %3093 = vrot.lane.b32.xlu1 %v5500_v24, %s5078_s11 }
0x120d   :  { %3091 = vrot.lane.b32.xlu1 %v5500_v24, %s5079_s18 }
0x1211   :  { %3171 = vrot.lane.b32.xlu1 %v5498_v22, %s5078_s11 }
0x1215   :  { %3169 = vrot.lane.b32.xlu1 %v5498_v22, %s5079_s18 }
0x1271   :  { %v2439_v47 = vpop.xlane.xlu1 %2438 }
0x1272   :  { %4980 = vrcp.f32 %v2439_v47 }
0x1275   :  { %v2524_v48 = vpop.permute.xlu1 %2523  ;;  %v2442_v49 = vpop.xlane.xlu0 %2441 }
0x1276   :  { %4982 = vrcp.f32 %v2442_v49  ;;  %4697 = vmatpush3.msra.mxu1 %v2524_v48 }
0x1277   :  { %4706 = vmatprep.subr.mxu1 %v5071_v12 }
0x1279   :  { %v2689_v51 = vpop.permute.xlu1 %2688  ;;  %v2448_v52 = vpop.permute.xlu0 %2447 }
0x127a   :  { %4692 = vmatpush3.msra.mxu0 %v2448_v52  ;;  %v4320_v52 = vld [vmem:[%s5747_s6 + $0x28] sm:$0xff] }
0x127b   :  { %4701 = vmatprep.subr.mxu0 %v4319_v50 }
0x127c   :  { %v4981_v53 = vpop.eup %4980 }
0x127d   :  { %v2445_v26 = vmul.f32 %v4981_v53, %v4977_v43  ;;  %v2687_v25 = vpop.permute.xlu1 %2686  ;;  %v2767_v61 = vpop.permute.xlu0 %2766 }
0x127f   :  { %4694 = vmatmul.mubr.msk.f32.vlgmr.msra.gmra.mrb[18].mxu0 %vm289_vm4, %v2445_v26 }
0x1280   :  { %v4983_v54 = vpop.eup %4982  ;;  %4702 = vmatpush3.msra.mxu0 %v4319_v50 }
0x1281   :  { %v2446_v55 = vmul.f32 %v4983_v54, %v4979_v45  ;;  %v2765_v56 = vpop.permute.xlu1 %2764  ;;  %4711 = vmatprep.subr.mxu0 %v5071_v12 }
0x1283   :  { %4699 = vmatmul.mubr.msk.f32.vlgmr.msra.gmra.mrb[30].mxu1 %vm289_vm4, %v2446_v55 }
0x1284   :  { %4707 = vmatpush3.xpose.msk.msra.mxu1 %vm289_vm4, %v2689_v51  ;;  %4708 = vmatprep.mubr.msk.f32.mxu1 %vm5072_vm3, %v5071_v12 }
0x1285   :  { %v2857_v57 = vpop.permute.xlu1 %2856  ;;  %4716 = vmatprep.subr.mxu1 %v5071_v12 }
0x1287   :  { %4709 = vmatmul.mubr.msk.f32.vlgmr.msra.gmra.mrb[32].mxu1 %vm289_vm4, %v2687_v25 }
0x1288   :  { %4717 = vmatpush3.msra.mxu1 %v2857_v57  ;;  %4718 = vmatprep.mubr.msk.f32.mxu1 %vm5072_vm3, %v5071_v12 }
0x1289   :  { %4731 = vmatprep.subr.mxu1 %v5071_v12  ;;  %v3094_v8 = vpop.permute.xlu1 %3093 }
0x1352   :  { %v2519_v58 = vpop.f32.mrb[18].mxu0 }
0x1353   :  { %v4695_v59 = vpop.f32.mrb[19].mxu0  ;;  %4703 = vmatprep.mubr.msk.f32.mxu0 %vm289_vm4, %v2519_v58 }
0x1356   :  { %v2595_v60 = vpop.f32.mrb[30].mxu1 }
0x1357   :  { %v4700_v62 = vpop.f32.mrb[31].mxu1  ;;  %4704 = vmatmul.mubr.msk.f32.vlgmr.msra.gmra.mrb[20].mxu0 %vm289_vm4, %v2595_v60 }
0x1358   :  { %4712 = vmatpush3.xpose.msk.msra.mxu0 %vm289_vm4, %v2767_v61  ;;  %4713 = vmatprep.mubr.msk.f32.mxu0 %vm5072_vm3, %v5071_v12 }
0x1359   :  { %4721 = vmatprep.subr.mxu0 %v5071_v12 }
0x135a   :  { %v2760_v63 = vpop.f32.mrb[32].mxu1 }
0x135b   :  { %v2761_v0 = vadd.f32 %v5245_v34, %v2760_v63  ;;  %v4710_v1 = vpop.f32.mrb[33].mxu1  ;;  %4714 = vmatmul.mubr.msk.f32.vlgmr.msra.gmra.mrb[22].mxu0 %vm289_vm4, %v2765_v56  ;;  %v3092_v34 = vpop.permute.xlu1 %3091 }
0x135c   :  { %4723 = vmatprep.mubr.msk.f32.mxu0 %vm5072_vm3, %v5071_v12 }
0x135d   :  { %v2842_v2 = vmul.f32 1.442695, %v2761_v0  ;;  %v4321_v0 = vld [vmem:[%s5747_s6 + $0x30] sm:$0xff] }
0x135f   :  { %4984 = vpow2.f32 %v2842_v2  ;;  %v3172_v15 = vpop.permute.xlu1 %3171 }
0x1363   :  { %v3170_v16 = vpop.permute.xlu1 %3169 }
0x1369   :  { %v4985_v3 = vpop.eup %4984 }
0x136a   :  { %v2846_v4 = vsel %vm289_vm4, %v4985_v3, 0.0 }
0x136b   :  { %2847 = vadd.xlane.f32.xlu0 %v2846_v4 }
0x1381   :  { %2932 = vrot.lane.b32.xlu0 %v5498_v22, %s5077_s21 }
0x13f8   :  { %v2848_v5 = vpop.xlane.xlu0 %2847 }
0x13f9   :  { %4986 = vrcp.f32 %v2848_v5 }
0x13fc   :  { %v2933_v9 = vpop.permute.xlu0 %2932 }
0x13fd   :  { %4722 = vmatpush3.msra.mxu0 %v2933_v9 }
0x13fe   :  { %4726 = vmatprep.subr.mxu0 %v4320_v52 }
0x1403   :  { %v4987_v11 = vpop.eup %4986 }
0x1404   :  { %v2854_v14 = vmul.f32 %v4987_v11, %v4985_v3 }
0x1406   :  { %4719 = vmatmul.mubr.msk.f32.vlgmr.msra.gmra.mrb[34].mxu1 %vm289_vm4, %v2854_v14 }
0x1407   :  { %4732 = vmatpush3.xpose.msk.msra.mxu1 %vm289_vm4, %v3094_v8  ;;  %4733 = vmatprep.mubr.msk.f32.mxu1 %vm5072_vm3, %v5071_v12 }
0x1408   :  { %4736 = vmatprep.subr.mxu1 %v5071_v12 }
0x140a   :  { %4734 = vmatmul.mubr.msk.f32.vlgmr.msra.gmra.mrb[36].mxu1 %vm289_vm4, %v3092_v34 }
0x140b   :  { %4737 = vmatpush3.xpose.msk.msra.mxu1 %vm289_vm4, %v3172_v15  ;;  %4738 = vmatprep.mubr.msk.f32.mxu1 %vm5072_vm3, %v5071_v12 }
0x140c   :  { %4746 = vmatprep.subr.mxu1 %v5071_v12 }
0x140e   :  { %4739 = vmatmul.mubr.msk.f32.vlgmr.msra.gmra.mrb[38].mxu1 %vm289_vm4, %v3170_v16 }
0x140f   :  { %4748 = vmatprep.mubr.msk.f32.mxu1 %vm5072_vm3, %v5071_v12 }
0x142e   :  { %v2838_v17 = vpop.f32.mrb[22].mxu0 }
0x142f   :  { %v2839_v18 = vadd.f32 %v5251_v38, %v2838_v17  ;;  %v4715_v21 = vpop.f32.mrb[23].mxu0 }
0x1431   :  { %v2844_v35 = vmul.f32 1.442695, %v2839_v18 }
0x1433   :  { %4988 = vpow2.f32 %v2844_v35 }
0x143d   :  { %v4989_v23 = vpop.eup %4988 }
0x143e   :  { %v2849_v27 = vsel %vm289_vm4, %v4989_v23, 0.0 }
0x143f   :  { %2850 = vadd.xlane.f32.xlu1 %v2849_v27 }
0x1450   :  { %3261 = vrot.lane.b32.xlu1 %v5500_v24, %s5080_s0 }
0x14cc   :  { %v2851_v28 = vpop.xlane.xlu1 %2850 }
0x14cd   :  { %4990 = vrcp.f32 %v2851_v28 }
0x14d0   :  { %v3262_v53 = vpop.permute.xlu1 %3261 }
0x14d7   :  { %v4991_v29 = vpop.eup %4990 }
0x14d8   :  { %v2855_v31 = vmul.f32 %v4991_v29, %v4989_v23 }
0x14d9   :  { %v2928_v36 = vpop.f32.mrb[34].mxu1 }
0x14da   :  { %v4720_v37 = vpop.f32.mrb[35].mxu1  ;;  %4724 = vmatmul.mubr.msk.f32.vlgmr.msra.gmra.mrb[24].mxu0 %vm289_vm4, %v2855_v31 }
0x14db   :  { %4728 = vmatprep.mubr.msk.f32.mxu0 %vm289_vm4, %v2928_v36  ;;  %4727 = vmatpush3.msra.mxu0 %v4320_v52 }
0x14dc   :  { %4741 = vmatprep.subr.mxu0 %v5071_v12 }
0x14dd   :  { %v3165_v38 = vpop.f32.mrb[36].mxu1 }
0x14de   :  { %v3166_v40 = vadd.f32 %v5016_v39, %v3165_v38  ;;  %v4735_v42 = vpop.f32.mrb[37].mxu1  ;;  %v4322_v38 = vld [vmem:[%s5747_s6 + $0x38] sm:$0xff] }
0x14e0   :  { %v3247_v13 = vmul.f32 1.442695, %v3166_v40 }
0x14e1   :  { %v3243_v43 = vpop.f32.mrb[38].mxu1 }
0x14e2   :  { %4992 = vpow2.f32 %v3247_v13  ;;  %v3244_v45 = vadd.f32 %v5597_v44, %v3243_v43  ;;  %v4740_v46 = vpop.f32.mrb[39].mxu1  ;;  %v5659_v43 = vld [vmem:[%s5751_s10 + $0x8] sm:$0x3f] }
0x14e4   :  { %v3249_v47 = vmul.f32 1.442695, %v3244_v45 }
0x14e6   :  { %4994 = vpow2.f32 %v3249_v47 }
0x14ec   :  { %v4993_v48 = vpop.eup %4992 }
0x14ed   :  { %v3251_v49 = vsel %vm289_vm4, %v4993_v48, 0.0 }
0x14ee   :  { %3252 = vadd.xlane.f32.xlu0 %v3251_v49 }
0x14f0   :  { %v4995_v50 = vpop.eup %4994 }
0x14f1   :  { %v3254_v51 = vsel %vm289_vm4, %v4995_v50, 0.0 }
0x14f2   :  { %3255 = vadd.xlane.f32.xlu1 %v3254_v51 }
0x1503   :  { %3337 = vrot.lane.b32.xlu1 %v5498_v22, %s5080_s0 }
0x1504   :  { %3498 = vrot.lane.b32.xlu0 %v5500_v24, %s5081_s23 }
0x1507   :  { %3576 = vrot.lane.b32.xlu1 %v5498_v22, %s5081_s23 }
0x150b   :  { %3496 = vrot.lane.b32.xlu1 %v5500_v24, %s5082_s24 }
0x150f   :  { %3574 = vrot.lane.b32.xlu1 %v5498_v22, %s5082_s24 }
0x157b   :  { %v3253_v54 = vpop.xlane.xlu0 %3252 }
0x157f   :  { %v3256_v26 = vpop.xlane.xlu1 %3255  ;;  %v3499_v58 = vpop.permute.xlu0 %3498 }
0x1580   :  { %4996 = vrcp.f32 %v3256_v26 }
0x1581   :  { %4998 = vrcp.f32 %v3253_v54 }
0x1583   :  { %v3338_v25 = vpop.permute.xlu1 %3337 }
0x1584   :  { %4747 = vmatpush3.msra.mxu1 %v3338_v25 }
0x1585   :  { %4756 = vmatprep.subr.mxu1 %v5071_v12 }
0x1587   :  { %v3577_v56 = vpop.permute.xlu1 %3576 }
0x158a   :  { %v4997_v55 = vpop.eup %4996 }
0x158b   :  { %v3260_v57 = vmul.f32 %v4997_v55, %v4995_v50  ;;  %v3497_v59 = vpop.permute.xlu1 %3496  ;;  %v4999_v60 = vpop.eup %4998 }
0x158c   :  { %v3259_v63 = vmul.f32 %v4999_v60, %v4993_v48 }
0x158d   :  { %4749 = vmatmul.mubr.msk.f32.vlgmr.msra.gmra.mrb[40].mxu1 %vm289_vm4, %v3260_v57 }
0x158e   :  { %4757 = vmatpush3.xpose.msk.msra.mxu1 %vm289_vm4, %v3499_v58  ;;  %4758 = vmatprep.mubr.msk.f32.mxu1 %vm5072_vm3, %v5071_v12 }
0x158f   :  { %4766 = vmatprep.subr.mxu1 %v5071_v12  ;;  %v3575_v15 = vpop.permute.xlu1 %3574 }
0x1591   :  { %4759 = vmatmul.mubr.msk.f32.vlgmr.msra.gmra.mrb[42].mxu1 %vm289_vm4, %v3497_v59  ;;  %v4356_v59 = vld [vmem:[%s5748_s7 + $0x28] sm:$0xff] }
0x1592   :  { %4768 = vmatprep.mubr.msk.f32.mxu1 %vm5072_vm3, %v5071_v12 }
0x15ad   :  { %v3004_v61 = vpop.f32.mrb[24].mxu0 }
0x15ae   :  { %v4725_v62 = vpop.f32.mrb[25].mxu0  ;;  %4729 = vmatmul.mubr.msk.f32.vlgmr.msra.gmra.mrb[20].mxu0 %vm289_vm4, %v3004_v61  ;;  %v4357_v61 = vld [vmem:[%s5748_s7 + $0x30] sm:$0xff] }
0x15af   :  { %4742 = vmatpush3.msra.mxu0 %v3262_v53  ;;  %4743 = vmatprep.mubr.msk.f32.mxu0 %vm5072_vm3, %v5071_v12  ;;  %v4358_v62 = vld [vmem:[%s5748_s7 + $0x38] sm:$0xff] }
0x15b0   :  { %4751 = vmatprep.subr.mxu0 %v4321_v0 }
0x15b2   :  { %4744 = vmatmul.mubr.msk.f32.vlgmr.msra.gmra.mrb[26].mxu0 %vm289_vm4, %v3259_v63  ;;  %v4874_v63 = vpack.c.bf16 %v4358_v62, %v4357_v61  ;;  %v4173_v61 = vld [vmem:[#allocation4 + $0x10] sm:$0xff]  ;;  %v4174_v62 = vld [vmem:[#allocation4 + $0x18] sm:$0xff] }
0x15b3   :  { %4752 = vmatpush3.msra.mxu0 %v4321_v0  ;;  %v4363_v0 = vld [vmem:[%s5750_s9 + $0x40] sm:$0xff] }
0x15b4   :  { %4761 = vmatprep.subr.mxu0 %v5071_v12 }
0x1660   :  { %v3409_v1 = vpop.f32.mrb[40].mxu1 }
0x1661   :  { %v4750_v2 = vpop.f32.mrb[41].mxu1 }
0x1662   :  { %v4365_v2 = vld [vmem:[%s5750_s9 + $0x50] sm:$0xff] }
0x1664   :  { %v3570_v3 = vpop.f32.mrb[42].mxu1 }
0x1665   :  { %v3571_v4 = vadd.f32 %v5016_v39, %v3570_v3  ;;  %v4760_v5 = vpop.f32.mrb[43].mxu1 }
0x1667   :  { %v3652_v8 = vmul.f32 1.442695, %v3571_v4  ;;  %v4366_v4 = vld [vmem:[%s5750_s9 + $0x58] sm:$0xff] }
0x1668   :  { %v4882_v5 = vpack.c.bf16 %v4366_v4, %v4365_v2 }
0x1669   :  { %5000 = vpow2.f32 %v3652_v8  ;;  %v4367_v8 = vld [vmem:[%s5750_s9 + $0x60] sm:$0xff] }
0x1673   :  { %v5001_v9 = vpop.eup %5000 }
0x1674   :  { %v3656_v34 = vsel %vm289_vm4, %v5001_v9, 0.0 }
0x1675   :  { %3657 = vadd.xlane.f32.xlu1 %v3656_v34 }
0x1685   :  { %v3333_v11 = vpop.f32.mrb[26].mxu0 }
0x1686   :  { %v4745_v14 = vpop.f32.mrb[27].mxu0  ;;  %4753 = vmatprep.mubr.msk.f32.mxu0 %vm289_vm4, %v3333_v11  ;;  %3666 = vrot.lane.b32.xlu1 %v5500_v24, %s5083_s29 }
0x1687   :  { %4754 = vmatmul.mubr.msk.f32.vlgmr.msra.gmra.mrb[20].mxu0 %vm289_vm4, %v3409_v1  ;;  %v4364_v1 = vld [vmem:[%s5750_s9 + $0x48] sm:$0xff] }
0x1688   :  { %4762 = vmatpush3.xpose.msk.msra.mxu0 %vm289_vm4, %v3577_v56  ;;  %4763 = vmatprep.mubr.msk.f32.mxu0 %vm5072_vm3, %v5071_v12  ;;  %v4878_v3 = vpack.c.bf16 %v4364_v1, %v4363_v0  ;;  %v4898_v0 = vpack.c.bf16 %v4174_v62, %v4173_v61 }
0x1689   :  { %4771 = vmatprep.subr.mxu0 %v5071_v12 }
0x168b   :  { %4764 = vmatmul.mubr.msk.f32.vlgmr.msra.gmra.mrb[28].mxu0 %vm289_vm4, %v3575_v15 }
0x168c   :  { %4773 = vmatprep.mubr.msk.f32.mxu0 %vm5072_vm3, %v5071_v12 }
0x1702   :  { %v3658_v16 = vpop.xlane.xlu1 %3657 }
0x1703   :  { %5002 = vrcp.f32 %v3658_v16 }
0x1706   :  { %v3667_v17 = vpop.permute.xlu1 %3666 }
0x1707   :  { %4767 = vmatpush3.msra.mxu1 %v3667_v17 }
0x170d   :  { %v5003_v24 = vpop.eup %5002 }
0x170e   :  { %v3664_v18 = vmul.f32 %v5003_v24, %v5001_v9  ;;  %v4368_v9 = vld [vmem:[%s5750_s9 + $0x68] sm:$0xff] }
0x170f   :  { %v4886_v34 = vpack.c.bf16 %v4368_v9, %v4367_v8  ;;  %v4162_v9 = vrot.slane %v5659_v43, %v2168_v6  ;;  %v4373_v6 = vld [vmem:[%s5753_s12] ss:$0 sm:$0xff] }
0x1710   :  { %4769 = vmatmul.mubr.msk.f32.vlgmr.msra.gmra.mrb[44].mxu1 %vm289_vm4, %v3664_v18  ;;  %v3932_v18 = vrot.slane %v5659_v43, %v1940_v10  ;;  %v4369_v10 = vld [vmem:[%s5750_s9 + $0x70] sm:$0xff] }
0x175e   :  { %v3648_v21 = vpop.f32.mrb[28].mxu0 }
0x175f   :  { %v3649_v35 = vadd.f32 %v5597_v44, %v3648_v21  ;;  %v4765_v23 = vpop.f32.mrb[29].mxu0  ;;  %v2683_v44 = vrot.slane %v5659_v43, %v690_v33 }
0x1760   :  { %v3938_v23 = vrot.slane %v5659_v43, %v1946_v30  ;;  %v4370_v30 = vld [vmem:[%s5750_s9 + $0x78] sm:$0xff] }
0x1761   :  { %v3654_v27 = vmul.f32 1.442695, %v3649_v35 }
0x1763   :  { %5004 = vpow2.f32 %v3654_v27 }
0x176d   :  { %v5005_v28 = vpop.eup %5004 }
0x176e   :  { %v3659_v29 = vsel %vm289_vm4, %v5005_v28, 0.0 }
0x176f   :  { %3660 = vadd.xlane.f32.xlu0 %v3659_v29 }
0x1785   :  { %3742 = vrot.lane.b32.xlu0 %v5498_v22, %s5083_s29 }
0x17e3   :  { %v3738_v31 = vpop.f32.mrb[44].mxu1 }
0x17e4   :  { %v4770_v36 = vpop.f32.mrb[45].mxu1 }
0x17fc   :  { %v3661_v37 = vpop.xlane.xlu0 %3660 }
0x17fd   :  { %5006 = vrcp.f32 %v3661_v37 }
0x1800   :  { %v3743_v39 = vpop.permute.xlu0 %3742 }
0x1801   :  { %4772 = vmatpush3.msra.mxu0 %v3743_v39  ;;  %v4360_v39 = vld [vmem:[%s5749_s8 + $0x1] ss:$0 sm:$0xff] }
0x1802   :  { %4776 = vmatprep.subr.mxu0 %v4322_v38 }
0x1807   :  { %v5007_v40 = vpop.eup %5006 }
0x1808   :  { %v3665_v42 = vmul.f32 %v5007_v40, %v5005_v28 }
0x180a   :  { %4774 = vmatmul.mubr.msk.f32.vlgmr.msra.gmra.mrb[30].mxu0 %vm289_vm4, %v3665_v42 }
0x180b   :  { %4778 = vmatprep.mubr.msk.f32.mxu0 %vm289_vm4, %v3738_v31  ;;  %4777 = vmatpush3.msra.mxu0 %v4322_v38  ;;  %v4890_v38 = vpack.c.bf16 %v4370_v30, %v4369_v10 }
0x180c   :  { %4879 = vmatprep.subr.bf16.mxu0 %v4878_v3 }
0x18dd   :  { %v3814_v13 = vpop.f32.mrb[30].mxu0 }
0x18de   :  { %v4775_v22 = vpop.f32.mrb[31].mxu0  ;;  %4779 = vmatmul.mubr.msk.f32.vlgmr.msra.gmra.mrb[20].mxu0 %vm289_vm4, %v3814_v13 }
0x18df   :  { %4881 = vmatpush3.bf16.msra.mxu0 %v4878_v3 }
0x18e0   :  { %4883 = vmatprep.subr.bf16.mxu0 %v4882_v5 }
0x18e3   :  { %4885 = vmatpush3.bf16.msra.mxu0 %v4882_v5 }
0x18e4   :  { %4887 = vmatprep.subr.bf16.mxu0 %v4886_v34 }
0x18e7   :  { %4889 = vmatpush3.bf16.msra.mxu0 %v4886_v34 }
0x18e8   :  { %4891 = vmatprep.subr.bf16.mxu0 %v4890_v38 }
0x18eb   :  { %4893 = vmatpush3.bf16.msra.mxu0 %v4890_v38 }
0x19b1   :  { %v4780_v45 = vpop.f32.mrb[20].mxu0 }
0x19b2   :  { %v4902_v46 = vadd.f32 %v4780_v45, %v2683_v44  ;;  %v3890_v47 = vpop.f32.mrb[21].mxu0  ;;  %v4049_v45 = vrot.slane %v5659_v43, %v2054_v41 }
0x19b3   :  { %v4903_v48 = vadd.f32 %v3890_v47, %v2683_v44 }
0x19b4   :  { %v3902_v49 = vadd.f32 %v4902_v46, %v5487_v20 }
0x19b5   :  { %v3901_v50 = vadd.f32 %v4903_v48, %v5485_v19  ;;  %v4355_v19 = vld [vmem:[%s5748_s7 + $0x20] sm:$0xff] }
0x19b6   :  { %v3906_v51 = vsel %vm92_vm0, %v3902_v49, 0.0  ;;  %v4870_v60 = vpack.c.bf16 %v4356_v59, %v4355_v19  ;;  %v4171_v19 = vld [vmem:[#allocation4] sm:$0xff]  ;;  %v4172_v59 = vld [vmem:[#allocation4 + $0x8] sm:$0xff] }
0x19b7   :  { %3907 = vadd.xlane.f32.xlu0 %v3906_v51  ;;  %v3903_v52 = vsel %vm92_vm0, %v3901_v50, 0.0 }
0x19b8   :  { %3904 = vadd.xlane.f32.xlu1 %v3903_v52  ;;  %4871 = vmatprep.subr.bf16.mxu1 %v4870_v60 }
0x19b9   :  { %4873 = vmatpush3.bf16.msra.mxu1 %v4870_v60  ;;  %v4895_v60 = vpack.c.bf16 %v4172_v59, %v4171_v19 }
0x19ba   :  { %4875 = vmatprep.subr.bf16.mxu1 %v4874_v63 }
0x19bd   :  { %4877 = vmatpush3.bf16.msra.mxu1 %v4874_v63  ;;  %v5084_v63 = vmov 0.0|0.0  }
0x19be   :  { %4894 = vmatprep.subr.bf16.mxu1 %v5084_v63 }
0x1a44   :  { %v3908_v53 = vpop.xlane.xlu0 %3907 }
0x1a45   :  { %v3910_v26 = vmul.f32 0.03125, %v3908_v53  ;;  %v3905_v25 = vpop.xlane.xlu1 %3904 }
0x1a46   :  { %v3909_v54 = vmul.f32 0.03125, %v3905_v25 }
0x1a47   :  { %v3912_v55 = vsub.f32 %v3902_v49, %v3910_v26 }
0x1a48   :  { %v3911_v33 = vsub.f32 %v3901_v50, %v3909_v54 }
0x1a49   :  { %v3914_v58 = vmul.f32 %v3912_v55, %v3912_v55 }
0x1a4a   :  { %v3913_v56 = vmul.f32 %v3911_v33, %v3911_v33 }
0x1a4b   :  { %v3918_v20 = vsel %vm92_vm0, %v3914_v58, 0.0 }
0x1a4c   :  { %v3915_v57 = vsel %vm92_vm0, %v3913_v56, 0.0 }
0x1a4d   :  { %3916 = vadd.xlane.f32.xlu1 %v3915_v57 }
0x1a51   :  { %3919 = vadd.xlane.f32.xlu1 %v3918_v20 }
0x1ada   :  { %v3917_v11 = vpop.xlane.xlu1 %3916 }
0x1adb   :  { %v3921_v14 = vmul.f32 0.03125, %v3917_v11 }
0x1add   :  { %v3923_v15 = vadd.f32 1e-05, %v3921_v14 }
0x1ade   :  { %v3920_v16 = vpop.xlane.xlu1 %3919 }
0x1adf   :  { %5008 = vrsqrt.f32 %v3923_v15  ;;  %v3922_v17 = vmul.f32 0.03125, %v3920_v16  ;;  %v4168_v15 = vrot.slane %v5659_v43, %v2174_v7 }
0x1ae1   :  { %v3924_v24 = vadd.f32 1e-05, %v3922_v17 }
0x1ae3   :  { %5010 = vrsqrt.f32 %v3924_v24 }
0x1ae9   :  { %v5009_v21 = vpop.eup %5008 }
0x1aea   :  { %v3927_v35 = vmul.f32 %v5009_v21, %v3911_v33 }
0x1aec   :  { %v3933_v27 = vmul.f32 %v3932_v18, %v3927_v35 }
0x1aed   :  { %v5011_v28 = vpop.eup %5010 }
0x1aee   :  { %v3928_v29 = vmul.f32 %v5011_v28, %v3912_v55  ;;  %v3939_v31 = vadd.f32 %v3938_v23, %v3933_v27 }
0x1af0   :  { %v3934_v36 = vmul.f32 %v3932_v18, %v3928_v29  ;;  %4789 = vmatprep.mubr.msk.f32.mxu1 %vm92_vm0, %v3939_v31 }
0x1af2   :  { %v3940_v37 = vadd.f32 %v3938_v23, %v3934_v36 }
0x1af4   :  { %4790 = vmatmul.mubr.msk.f32.vlgmr.msra.gmra.mrb[46].mxu1 %vm92_vm0, %v3940_v37 }
0x1af5   :  { %4819 = vmatprep.mubr.msk.f32.mxu1 %vm5072_vm3, %v5071_v12  ;;  %4896 = vmatpush3.bf16.msra.mxu1 %v4895_v60 }
0x1af6   :  { %4897 = vmatprep.subr.bf16.mxu1 %v5084_v63 }
0x1af9   :  { %4899 = vmatpush3.bf16.msra.mxu1 %v4898_v0 }
0x1bc7   :  { %v4791_v40 = vpop.f32.mrb[46].mxu1 }
0x1bc8   :  { %v4032_v42 = vadd.f32 %v4791_v40, %v4360_v39  ;;  %v4026_v13 = vpop.f32.mrb[47].mxu1 }
0x1bc9   :  { %v4027_v22 = vadd.f32 %v4360_v39, %v4026_v13 }
0x1bca   :  { %v4036_v44 = vmax.f32 %v4032_v42, 0.0 }
0x1bcb   :  { %v4035_v12 = vmax.f32 %v4027_v22, 0.0 }
0x1bcd   :  { %4808 = vmatprep.mubr.msk.f32.mxu0 %vm2056_vm5, %v4035_v12 }
0x1bce   :  { %4809 = vmatmul.mubr.msk.f32.vlgmr.msra.gmra.mrb[32].mxu0 %vm2056_vm5, %v4036_v44 }
0x1ca1   :  { %v4810_v46 = vpop.f32.mrb[32].mxu0 }
0x1ca2   :  { %v4128_v47 = vadd.f32 %v4810_v46, %v4049_v45  ;;  %v4122_v48 = vpop.f32.mrb[33].mxu0 }
0x1ca3   :  { %v4123_v49 = vadd.f32 %v4122_v48, %v4049_v45 }
0x1ca4   :  { %v4132_v50 = vadd.f32 %v4128_v47, %v3940_v37 }
0x1ca5   :  { %v4131_v51 = vadd.f32 %v4123_v49, %v3939_v31 }
0x1ca6   :  { %v4136_v52 = vsel %vm92_vm0, %v4132_v50, 0.0 }
0x1ca7   :  { %4137 = vadd.xlane.f32.xlu0 %v4136_v52  ;;  %v4133_v53 = vsel %vm92_vm0, %v4131_v51, 0.0 }
0x1ca8   :  { %4134 = vadd.xlane.f32.xlu1 %v4133_v53 }
0x1d34   :  { %v4138_v26 = vpop.xlane.xlu0 %4137 }
0x1d35   :  { %v4140_v25 = vmul.f32 0.03125, %v4138_v26  ;;  %v4135_v54 = vpop.xlane.xlu1 %4134 }
0x1d36   :  { %v4139_v55 = vmul.f32 0.03125, %v4135_v54 }
0x1d37   :  { %v4142_v33 = vsub.f32 %v4132_v50, %v4140_v25 }
0x1d38   :  { %v4141_v56 = vsub.f32 %v4131_v51, %v4139_v55 }
0x1d39   :  { %v4144_v57 = vmul.f32 %v4142_v33, %v4142_v33 }
0x1d3a   :  { %v4143_v41 = vmul.f32 %v4141_v56, %v4141_v56 }
0x1d3b   :  { %v4148_v58 = vsel %vm92_vm0, %v4144_v57, 0.0 }
0x1d3c   :  { %4149 = vadd.xlane.f32.xlu0 %v4148_v58  ;;  %v4145_v20 = vsel %vm92_vm0, %v4143_v41, 0.0 }
0x1d3d   :  { %4146 = vadd.xlane.f32.xlu1 %v4145_v20 }
0x1dc9   :  { %v4150_v1 = vpop.xlane.xlu0 %4149 }
0x1dca   :  { %v4152_v2 = vmul.f32 0.03125, %v4150_v1  ;;  %v4147_v3 = vpop.xlane.xlu1 %4146 }
0x1dcb   :  { %v4151_v4 = vmul.f32 0.03125, %v4147_v3 }
0x1dcc   :  { %v4154_v5 = vadd.f32 1e-05, %v4152_v2 }
0x1dcd   :  { %v4153_v8 = vadd.f32 1e-05, %v4151_v4 }
0x1dce   :  { %5012 = vrsqrt.f32 %v4154_v5 }
0x1dcf   :  { %5014 = vrsqrt.f32 %v4153_v8 }
0x1dd8   :  { %v5013_v34 = vpop.eup %5012 }
0x1dd9   :  { %v5015_v11 = vpop.eup %5014  ;;  %v4158_v14 = vmul.f32 %v5013_v34, %v4142_v33 }
0x1dda   :  { %v4157_v16 = vmul.f32 %v5015_v11, %v4141_v56 }
0x1ddb   :  { %v4164_v17 = vmul.f32 %v4162_v9, %v4158_v14 }
0x1ddc   :  { %v4163_v24 = vmul.f32 %v4162_v9, %v4157_v16 }
0x1ddd   :  { %v4170_v18 = vadd.f32 %v4168_v15, %v4164_v17 }
0x1dde   :  { %v4169_v21 = vadd.f32 %v4168_v15, %v4163_v24 }
0x1ddf   :  { %v4184_v35 = vrot.slane %v4170_v18, 7 }
0x1de1   :  { %v4186_v23 = vsel %vm4185_vm6, %v4184_v35, %v4169_v21 }
0x1de2   :  { %4820 = vmatmul.mubr.msk.f32.vlgmr.msra.gmra.mrb[48].mxu1 %vm92_vm0, %v4186_v23 }
0x1eb5   :  { %v4255_v27 = vpop.f32.mrb[48].mxu1 }
0x1eb6   :  { %v4256_v28 = vadd.f32 %v4373_v6, %v4255_v27  ;;  %v4821_v29 = vpop.f32.mrb[49].mxu1 }
0x1eb8   :  { %4259 = vst [vmem:[%s5754_s13] sm:$0x3] %v4256_v28 }
0x1eb9   :  { %4264 = vsyncpa [#allocation3], 1 }
0x1eba   :  { %4265 = vsyncpa [#allocation5], 1 }

</bundles_post_ra>
